<compile_context>
chip_gen: v5e
topology: v5e:2x2
jax: 0.10.0
libtpu: 0.0.40
codegen_flags: <defaults>
</compile_context>

<pallas_src>
import functools

import jax
import jax.numpy as jnp
import numpy as np
from jax import lax
from jax.experimental import pallas as pl
from jax.experimental.pallas import tpu as pltpu

EMBED_LEN = 50      # embedding width
HIDDEN_DIM = 75     # per-direction hidden width
EP = 64             # padded per-direction embedding width (lane-aligned half)
HP = 128            # padded per-direction hidden width (lane-aligned)
CP = 128            # padded number of classes (lane-dense output store)


def birnn_kernel(maxlen_ref,                                  # scalar prefetch
                 hi_ref, ecat_ref, wproj_ref, bcat_ref,       # inputs
                 whh_ref, wlin_ref, blin_ref,
                 out_ref,                                     # output
                 h_ref, xp_ref,                               # VMEM scratch
                 *, chunk_t, bt, unroll, split_dot):
    """Grid = (batch tile ["parallel"], time chunk ["arbitrary"])."""
    c = pl.program_id(1)
    nc = pl.num_programs(1)

    @pl.when(c == 0)
    def _init():
        h_ref[...] = jnp.zeros_like(h_ref)

    start = c * chunk_t

    # Both directions are left-aligned to steps [0, len); any chunk starting at
    # or past max(len) is pure padding for every sequence -> skip it entirely.
    @pl.when(start < maxlen_ref[0])
    def _run():
        # Fused per-chunk input projection (block-diagonal fwd|bwd weight).
        # No serial dependence -> pipelines under the recurrence.
        e = ecat_ref[...].reshape(chunk_t * bt, 2 * EP)
        xp = jnp.dot(e, wproj_ref[...],
                     preferred_element_type=jnp.float32) + bcat_ref[...]
        xp_ref[...] = xp.reshape(chunk_t, bt, 2 * HP)

        hi = hi_ref[...]                      # (bt, 2*HP): per-row valid length
        # Hoist the recurrent weight read out of the step body so the RHS stays
        # resident across the whole chunk.
        if split_dot:                         # v5e: two 128-wide dots (no zero blocks)
            whh_f = whh_ref[:HP, :HP]
            whh_b = whh_ref[HP:, HP:]
        else:                                 # v6e/v7x: one 256x256 MXU tile per step
            whh = whh_ref[...]

        def step(j, h):
            # h-independent work (load + mask) is outside the serial chain.
            x = xp_ref[j]                     # (bt, 2*HP) f32
            mask = (start + j) < hi
            hb = h.astype(jnp.bfloat16)       # single-pass MXU matmul inputs
            if split_dot:
                pre = jnp.concatenate(
                    [jnp.dot(hb[:, :HP], whh_f,
                             preferred_element_type=jnp.float32),
                     jnp.dot(hb[:, HP:], whh_b,
                             preferred_element_type=jnp.float32)],
                    axis=-1) + x
            else:
                pre = jnp.dot(hb, whh, preferred_element_type=jnp.float32) + x
            return jnp.where(mask, jnp.tanh(pre), h)

        h_ref[...] = lax.fori_loop(0, chunk_t, step, h_ref[...], unroll=unroll)

    @pl.when(c == nc - 1)
    def _finish():
        # Dropout(0.7) is identity in eval mode.
        h = h_ref[...]
        out_ref[...] = (jnp.dot(h, wlin_ref[...],
                                preferred_element_type=jnp.float32)
                        + blin_ref[...])


def _is_v5e():
    try:
        kind = jax.devices()[0].device_kind.lower()
    except Exception:
        return False
    return ("v5 lite" in kind) or ("v5e" in kind) or ("v5litepod" in kind)


def rnn_forward(token_ids, lengths, params, *, chunk_t=None, batch_tile=None,
                split_dot=None):
    """token_ids: (B, T) int32 ; lengths: (B,) int32 ; returns (B, num_classes)."""
    E, H = EMBED_LEN, HIDDEN_DIM
    B, T = token_ids.shape
    num_classes = params["b_lin"].shape[-1]

    if split_dot is None:
        split_dot = _is_v5e()

    # Batch tiling: bigger tiles amortize the serial recurrence (extra rows are
    # nearly free on the MXU); >=2 tiles lets the "parallel" axis use both
    # TensorCores on v7x.
    if batch_tile is None:
        batch_tile = min(max(8, -(-B // 8) * 8), 64)
    bt = batch_tile
    B_pad = -(-B // bt) * bt
    nb = B_pad // bt

    if chunk_t is None:
        chunk_t = min(T, 32)
    T_pad = -(-T // chunk_t) * chunk_t
    n_chunks = T_pad // chunk_t
    unroll = True if chunk_t <= 32 else 8

    lens = lengths.astype(jnp.int32)
    f32 = jnp.float32

    # ---- zero-pad parameters to lane-aligned shapes (results unchanged) ----
    # block-diagonal input projection: (fwd emb | bwd emb) -> (fwd pre | bwd pre)
    wproj = jnp.zeros((2 * EP, 2 * HP), f32)
    wproj = wproj.at[:E, :H].set(params["wih_f"])
    wproj = wproj.at[EP:EP + E, HP:HP + H].set(params["wih_b"])
    bcat = jnp.zeros((1, 2 * HP), f32)
    bcat = bcat.at[:, :H].set(params["b_f"])
    bcat = bcat.at[:, HP:HP + H].set(params["b_b"])

    # block-diagonal recurrent weight, stored bf16 (single MXU pass per step)
    whh = jnp.zeros((2 * HP, 2 * HP), f32)
    whh = whh.at[:H, :H].set(params["whh_f"])
    whh = whh.at[HP:HP + H, HP:HP + H].set(params["whh_b"])
    whh = whh.astype(jnp.bfloat16)

    wlin = jnp.zeros((2 * HP, CP), f32)
    wlin = wlin.at[:H, :num_classes].set(params["wlin_f"])
    wlin = wlin.at[HP:HP + H, :num_classes].set(params["wlin_b"])
    blin = jnp.zeros((1, CP), f32).at[:, :num_classes].set(params["b_lin"])

    # ---- embedding gather + left-aligned reversed stream for backward dir ----
    emb = jnp.take(params["embedding"], token_ids, axis=0).astype(f32)   # (B,T,E)
    # backward direction consumes x[len-1], x[len-2], ..., x[0] at steps 0..len-1
    ridx = jnp.clip(lens[:, None] - 1 - jnp.arange(T)[None, :], 0, T - 1)
    emb_rev = jnp.take_along_axis(emb, ridx[:, :, None], axis=1)         # (B,T,E)

    ecat = jnp.zeros((T_pad, B_pad, 2 * EP), f32)
    ecat = ecat.at[:T, :B, :E].set(jnp.transpose(emb, (1, 0, 2)))
    ecat = ecat.at[:T, :B, EP:EP + E].set(jnp.transpose(emb_rev, (1, 0, 2)))

    # per-row step gate: step i updates row b iff i < len[b] (both directions);
    # padded batch rows have len = 0 so they never update.
    lens_pad = jnp.zeros((B_pad,), jnp.int32).at[:B].set(lens)
    hi = jnp.broadcast_to(lens_pad[:, None], (B_pad, 2 * HP)).astype(jnp.int32)
    max_len = jnp.max(lens).astype(jnp.int32).reshape(1)

    kernel = functools.partial(birnn_kernel, chunk_t=chunk_t, bt=bt,
                               unroll=unroll, split_dot=split_dot)

    grid_spec = pltpu.PrefetchScalarGridSpec(
        num_scalar_prefetch=1,
        grid=(nb, n_chunks),
        in_specs=[
            pl.BlockSpec((bt, 2 * HP), lambda b, c, ml: (b, 0)),              # hi
            pl.BlockSpec((chunk_t, bt, 2 * EP), lambda b, c, ml: (c, b, 0)),  # ecat
            pl.BlockSpec((2 * EP, 2 * HP), lambda b, c, ml: (0, 0)),          # wproj
            pl.BlockSpec((1, 2 * HP), lambda b, c, ml: (0, 0)),               # bcat
            pl.BlockSpec((2 * HP, 2 * HP), lambda b, c, ml: (0, 0)),          # whh (bf16)
            pl.BlockSpec((2 * HP, CP), lambda b, c, ml: (0, 0)),              # wlin
            pl.BlockSpec((1, CP), lambda b, c, ml: (0, 0)),                   # blin
        ],
        out_specs=pl.BlockSpec((bt, CP), lambda b, c, ml: (b, 0)),
        scratch_shapes=[pltpu.VMEM((bt, 2 * HP), jnp.float32),               # h state
                        pltpu.VMEM((chunk_t, bt, 2 * HP), jnp.float32)],     # x proj
    )

    # VMEM budget from the real footprint (stream is double-buffered).
    stream_bytes = chunk_t * bt * (2 * EP) * 4
    xp_bytes = chunk_t * bt * (2 * HP) * 4
    weight_bytes = ((2 * HP) * (2 * HP) * 2 +
                    (2 * EP + 2 * HP + 2) * (2 * HP) * 4 + (2 * HP) * CP * 4)
    vmem_limit = int(min(100 << 20,
                         max(8 << 20, 4 * stream_bytes + 2 * xp_bytes
                             + 2 * weight_bytes + (2 << 20))))

    out_full = pl.pallas_call(
        kernel,
        out_shape=jax.ShapeDtypeStruct((B_pad, CP), jnp.float32),
        grid_spec=grid_spec,
        compiler_params=pltpu.CompilerParams(
            dimension_semantics=("parallel", "arbitrary"),
            vmem_limit_bytes=vmem_limit),
    )(max_len, hi, ecat, wproj, bcat, whh, wlin, blin)

    return out_full[:B, :num_classes]


def init_params(key, vocab_size, num_classes):
    E, H = EMBED_LEN, HIDDEN_DIM
    ks = jax.random.split(key, 12)
    k_rnn = 1.0 / np.sqrt(H)
    k_lin = 1.0 / np.sqrt(2 * H)

    def u(k, shape, bound):
        return jax.random.uniform(k, shape, jnp.float32, -bound, bound)

    return {
        "embedding": jax.random.normal(ks[0], (vocab_size, E), jnp.float32),
        # forward-direction RNN weights (stored transposed: (in, out))
        "wih_f": u(ks[1], (E, H), k_rnn),
        "whh_f": u(ks[2], (H, H), k_rnn),
        "b_f": u(ks[3], (1, H), k_rnn) + u(ks[4], (1, H), k_rnn),   # b_ih + b_hh
        # backward-direction RNN weights
        "wih_b": u(ks[5], (E, H), k_rnn),
        "whh_b": u(ks[6], (H, H), k_rnn),
        "b_b": u(ks[7], (1, H), k_rnn) + u(ks[8], (1, H), k_rnn),
        # linear head: torch weight (C, 2H) transposed and split into halves
        "wlin_f": u(ks[9], (H, num_classes), k_lin),
        "wlin_b": u(ks[10], (H, num_classes), k_lin),
        "b_lin": u(ks[11], (1, num_classes), k_lin),
    }


def rnn_reference(token_ids, lengths, params):
    """Pure-JAX f32 reference with identical semantics (correctness check)."""
    emb = jnp.take(params["embedding"], token_ids, axis=0)   # (B, T, E)
    B, T, _ = emb.shape
    H = HIDDEN_DIM
    lens = lengths.astype(jnp.int32)
    hp_prec = lax.Precision.HIGHEST

    def make_step(wih, whh, b):
        def step(h, t):
            x = emb[:, t, :]
            h_new = jnp.tanh(jnp.dot(x, wih, precision=hp_prec)
                             + jnp.dot(h, whh, precision=hp_prec) + b)
            return jnp.where((t < lens)[:, None], h_new, h), None
        return step

    h0 = jnp.zeros((B, H), jnp.float32)
    h_f, _ = lax.scan(make_step(params["wih_f"], params["whh_f"], params["b_f"]),
                      h0, jnp.arange(T))
    h_b, _ = lax.scan(make_step(params["wih_b"], params["whh_b"], params["b_b"]),
                      h0, jnp.arange(T)[::-1])
    return (jnp.dot(h_f, params["wlin_f"], precision=hp_prec)
            + jnp.dot(h_b, params["wlin_b"], precision=hp_prec)
            + params["b_lin"])


if __name__ == "__main__":
    VOCAB_SIZE = 100
    NUM_CLASSES = 4

    key = jax.random.PRNGKey(0)
    k_params, k_tok1, k_tok2 = jax.random.split(key, 3)
    params = init_params(k_params, VOCAB_SIZE, NUM_CLASSES)

    forward = jax.jit(rnn_forward)

    # Tolerance note: the recurrent h@Whh dot uses bf16 inputs (f32 accumulate);
    # the tanh-bounded state keeps the drift vs. the f32 reference at ~1e-3, so
    # 2e-2 is a comfortable-but-meaningful bound.
    TOL = 2e-2

    # Case 1: small batch, single time chunk (full-length and padded sequences).
    B1, T1 = 2, 8
    tok1 = jax.random.randint(k_tok1, (B1, T1), 0, VOCAB_SIZE, dtype=jnp.int32)
    len1 = jnp.array([8, 5], dtype=jnp.int32)
    out1 = jax.block_until_ready(forward(tok1, len1, params))
    ref1 = rnn_reference(tok1, len1, params)
    np.testing.assert_allclose(np.asarray(out1), np.asarray(ref1),
                               rtol=TOL, atol=TOL)

    # Case 2: multiple time chunks, a dead trailing chunk (max_len < T) and a
    # padded batch tile -- exercises chunk skipping and the left-aligned
    # backward stream across chunk boundaries.
    B2, T2 = 4, 40
    tok2 = jax.random.randint(k_tok2, (B2, T2), 0, VOCAB_SIZE, dtype=jnp.int32)
    len2 = jnp.array([23, 17, 9, 1], dtype=jnp.int32)
    out2 = jax.block_until_ready(forward(tok2, len2, params))
    ref2 = rnn_reference(tok2, len2, params)
    np.testing.assert_allclose(np.asarray(out2), np.asarray(ref2),
                               rtol=TOL, atol=TOL)

    print("KERNEL_OK")
</pallas_src>

<mosaic_0001>
module attributes {stable_mosaic.version = 11 : i64} {
  func.func @birnn_kernel(%arg0: i32, %arg1: i32, %arg2: memref<1xi32, #tpu.memory_space<smem>>, %arg3: memref<8x256xi32, #tpu.memory_space<vmem>>, %arg4: memref<8x8x128xf32, #tpu.memory_space<vmem>>, %arg5: memref<128x256xf32, #tpu.memory_space<vmem>>, %arg6: memref<1x256xf32, #tpu.memory_space<vmem>>, %arg7: memref<256x256xbf16, #tpu.memory_space<vmem>>, %arg8: memref<256x128xf32, #tpu.memory_space<vmem>>, %arg9: memref<1x128xf32, #tpu.memory_space<vmem>>, %arg10: memref<8x128xf32, #tpu.memory_space<vmem>>, %arg11: memref<8x256xf32, #tpu.memory_space<vmem>>, %arg12: memref<8x8x256xf32, #tpu.memory_space<vmem>>) attributes {dimension_semantics = [#tpu.dimension_semantics<parallel>, #tpu.dimension_semantics<arbitrary>], iteration_bounds = array<i64: 1, 1>, scalar_prefetch = 1 : i64, scratch_operands = 2 : i64, tpu.core_type = #tpu.core_type<tc>, window_params = [{transform_indices = @transform_0, window_bounds = array<i64: 8, 256>}, {transform_indices = @transform_1, window_bounds = array<i64: 8, 8, 128>}, {pipeline_mode = #tpu.pipeline_mode<synchronous>, transform_indices = @transform_2, window_bounds = array<i64: 128, 256>}, {pipeline_mode = #tpu.pipeline_mode<synchronous>, transform_indices = @transform_3, window_bounds = array<i64: 1, 256>}, {pipeline_mode = #tpu.pipeline_mode<synchronous>, transform_indices = @transform_4, window_bounds = array<i64: 256, 256>}, {pipeline_mode = #tpu.pipeline_mode<synchronous>, transform_indices = @transform_5, window_bounds = array<i64: 256, 128>}, {pipeline_mode = #tpu.pipeline_mode<synchronous>, transform_indices = @transform_6, window_bounds = array<i64: 1, 128>}, {transform_indices = @transform_7, window_bounds = array<i64: 8, 128>}]} {
    %c0_i32 = arith.constant 0 : i32
    %0 = arith.cmpi eq, %arg1, %c0_i32 : i32
    %1 = arith.extui %0 : i1 to i32
    %c0_i32_0 = arith.constant 0 : i32
    %2 = arith.cmpi ne, %1, %c0_i32_0 : i32
    scf.if %2 {
      %cst = arith.constant 0.000000e+00 : f32
      %11 = vector.broadcast %cst : f32 to vector<8x256xf32>
      %c0_4 = arith.constant 0 : index
      %c0_5 = arith.constant 0 : index
      %12 = vector.load %arg11[%c0_4, %c0_5] : memref<8x256xf32, #tpu.memory_space<vmem>>, vector<8x256xf32>
      tpu.vector_store %arg11[%c0_4, %c0_5], %11 {strides = array<i32>} : memref<8x256xf32, #tpu.memory_space<vmem>>, vector<8x256xf32>,
    } else {
    }
    %c8_i32 = arith.constant 8 : i32
    %3 = arith.muli %arg1, %c8_i32 : i32
    %c0 = arith.constant 0 : index
    %4 = memref.load %arg2[%c0] : memref<1xi32, #tpu.memory_space<smem>>
    %5 = arith.cmpi slt, %3, %4 : i32
    %6 = arith.extui %5 : i1 to i32
    %c0_i32_1 = arith.constant 0 : i32
    %7 = arith.cmpi ne, %6, %c0_i32_1 : i32
    scf.if %7 {
      %c0_4 = arith.constant 0 : index
      %c0_5 = arith.constant 0 : index
      %c0_6 = arith.constant 0 : index
      %11 = vector.load %arg4[%c0_4, %c0_5, %c0_6] : memref<8x8x128xf32, #tpu.memory_space<vmem>>, vector<8x8x128xf32>
      %12 = vector.shape_cast %11 : vector<8x8x128xf32> to vector<64x128xf32>
      %c0_7 = arith.constant 0 : index
      %c0_8 = arith.constant 0 : index
      %13 = vector.load %arg5[%c0_7, %c0_8] : memref<128x256xf32, #tpu.memory_space<vmem>>, vector<128x256xf32>
      %cst = arith.constant dense<0.000000e+00> : vector<64x256xf32>
      %14 = tpu.matmul %12, %13, %cst {dimension_numbers = #tpu.dot_dimension_numbers<[1], [0], [0], [1], [0, 0, 1, 1], [], []>} : vector<64x128xf32>, vector<128x256xf32>, vector<64x256xf32> -> vector<64x256xf32>
      %c0_9 = arith.constant 0 : index
      %c0_10 = arith.constant 0 : index
      %15 = vector.load %arg6[%c0_9, %c0_10] : memref<1x256xf32, #tpu.memory_space<vmem>>, vector<1x256xf32>
      %16 = vector.broadcast %15 : vector<1x256xf32> to vector<64x256xf32>
      %17 = arith.addf %14, %16 : vector<64x256xf32>
      %18 = vector.shape_cast %17 : vector<64x256xf32> to vector<8x8x256xf32>
      %c0_11 = arith.constant 0 : index
      %c0_12 = arith.constant 0 : index
      %c0_13 = arith.constant 0 : index
      %19 = vector.load %arg12[%c0_11, %c0_12, %c0_13] : memref<8x8x256xf32, #tpu.memory_space<vmem>>, vector<8x8x256xf32>
      tpu.vector_store %arg12[%c0_11, %c0_12, %c0_13], %18 {strides = array<i32>} : memref<8x8x256xf32, #tpu.memory_space<vmem>>, vector<8x8x256xf32>,
      %c0_14 = arith.constant 0 : index
      %c0_15 = arith.constant 0 : index
      %20 = vector.load %arg3[%c0_14, %c0_15] : memref<8x256xi32, #tpu.memory_space<vmem>>, vector<8x256xi32>
      %c0_16 = arith.constant 0 : index
      %c0_17 = arith.constant 0 : index
      %21 = vector.load %arg7[%c0_16, %c0_17] : memref<256x256xbf16, #tpu.memory_space<vmem>>, vector<256x256xbf16>
      %c0_18 = arith.constant 0 : index
      %c0_19 = arith.constant 0 : index
      %22 = vector.load %arg11[%c0_18, %c0_19] : memref<8x256xf32, #tpu.memory_space<vmem>>, vector<8x256xf32>
      %c0_i32_20 = arith.constant 0 : i32
      %23 = arith.index_cast %c0_i32_20 : i32 to index
      %c0_21 = arith.constant 0 : index
      %c0_22 = arith.constant 0 : index
      %24 = vector.load %arg12[%23, %c0_21, %c0_22] : memref<8x8x256xf32, #tpu.memory_space<vmem>>, vector<1x8x256xf32>
      %25 = vector.shape_cast %24 : vector<1x8x256xf32> to vector<8x256xf32>
      %26 = arith.addi %3, %c0_i32_20 : i32
      %27 = vector.broadcast %26 : i32 to vector<8x256xi32>
      %28 = arith.cmpi slt, %27, %20 : vector<8x256xi32>
      %29 = arith.truncf %22 : vector<8x256xf32> to vector<8x256xbf16>
      %cst_23 = arith.constant dense<0.000000e+00> : vector<8x256xf32>
      %30 = tpu.matmul %29, %21, %cst_23 {dimension_numbers = #tpu.dot_dimension_numbers<[1], [0], [0], [1], [0, 0, 1, 1], [], []>} : vector<8x256xbf16>, vector<256x256xbf16>, vector<8x256xf32> -> vector<8x256xf32>
      %31 = arith.addf %30, %25 : vector<8x256xf32>
      %32 = math.tanh %31 : vector<8x256xf32>
      %33 = arith.select %28, %32, %22 : vector<8x256xi1>, vector<8x256xf32>
      %c1_i32 = arith.constant 1 : i32
      %34 = arith.index_cast %c1_i32 : i32 to index
      %c0_24 = arith.constant 0 : index
      %c0_25 = arith.constant 0 : index
      %35 = vector.load %arg12[%34, %c0_24, %c0_25] : memref<8x8x256xf32, #tpu.memory_space<vmem>>, vector<1x8x256xf32>
      %36 = vector.shape_cast %35 : vector<1x8x256xf32> to vector<8x256xf32>
      %37 = arith.addi %3, %c1_i32 : i32
      %38 = vector.broadcast %37 : i32 to vector<8x256xi32>
      %39 = arith.cmpi slt, %38, %20 : vector<8x256xi32>
      %40 = arith.truncf %33 : vector<8x256xf32> to vector<8x256xbf16>
      %cst_26 = arith.constant dense<0.000000e+00> : vector<8x256xf32>
      %41 = tpu.matmul %40, %21, %cst_26 {dimension_numbers = #tpu.dot_dimension_numbers<[1], [0], [0], [1], [0, 0, 1, 1], [], []>} : vector<8x256xbf16>, vector<256x256xbf16>, vector<8x256xf32> -> vector<8x256xf32>
      %42 = arith.addf %41, %36 : vector<8x256xf32>
      %43 = math.tanh %42 : vector<8x256xf32>
      %44 = arith.select %39, %43, %33 : vector<8x256xi1>, vector<8x256xf32>
      %c2_i32 = arith.constant 2 : i32
      %45 = arith.index_cast %c2_i32 : i32 to index
      %c0_27 = arith.constant 0 : index
      %c0_28 = arith.constant 0 : index
      %46 = vector.load %arg12[%45, %c0_27, %c0_28] : memref<8x8x256xf32, #tpu.memory_space<vmem>>, vector<1x8x256xf32>
      %47 = vector.shape_cast %46 : vector<1x8x256xf32> to vector<8x256xf32>
      %48 = arith.addi %3, %c2_i32 : i32
      %49 = vector.broadcast %48 : i32 to vector<8x256xi32>
      %50 = arith.cmpi slt, %49, %20 : vector<8x256xi32>
      %51 = arith.truncf %44 : vector<8x256xf32> to vector<8x256xbf16>
      %cst_29 = arith.constant dense<0.000000e+00> : vector<8x256xf32>
      %52 = tpu.matmul %51, %21, %cst_29 {dimension_numbers = #tpu.dot_dimension_numbers<[1], [0], [0], [1], [0, 0, 1, 1], [], []>} : vector<8x256xbf16>, vector<256x256xbf16>, vector<8x256xf32> -> vector<8x256xf32>
      %53 = arith.addf %52, %47 : vector<8x256xf32>
      %54 = math.tanh %53 : vector<8x256xf32>
      %55 = arith.select %50, %54, %44 : vector<8x256xi1>, vector<8x256xf32>
      %c3_i32 = arith.constant 3 : i32
      %56 = arith.index_cast %c3_i32 : i32 to index
      %c0_30 = arith.constant 0 : index
      %c0_31 = arith.constant 0 : index
      %57 = vector.load %arg12[%56, %c0_30, %c0_31] : memref<8x8x256xf32, #tpu.memory_space<vmem>>, vector<1x8x256xf32>
      %58 = vector.shape_cast %57 : vector<1x8x256xf32> to vector<8x256xf32>
      %59 = arith.addi %3, %c3_i32 : i32
      %60 = vector.broadcast %59 : i32 to vector<8x256xi32>
      %61 = arith.cmpi slt, %60, %20 : vector<8x256xi32>
      %62 = arith.truncf %55 : vector<8x256xf32> to vector<8x256xbf16>
      %cst_32 = arith.constant dense<0.000000e+00> : vector<8x256xf32>
      %63 = tpu.matmul %62, %21, %cst_32 {dimension_numbers = #tpu.dot_dimension_numbers<[1], [0], [0], [1], [0, 0, 1, 1], [], []>} : vector<8x256xbf16>, vector<256x256xbf16>, vector<8x256xf32> -> vector<8x256xf32>
      %64 = arith.addf %63, %58 : vector<8x256xf32>
      %65 = math.tanh %64 : vector<8x256xf32>
      %66 = arith.select %61, %65, %55 : vector<8x256xi1>, vector<8x256xf32>
      %c4_i32 = arith.constant 4 : i32
      %67 = arith.index_cast %c4_i32 : i32 to index
      %c0_33 = arith.constant 0 : index
      %c0_34 = arith.constant 0 : index
      %68 = vector.load %arg12[%67, %c0_33, %c0_34] : memref<8x8x256xf32, #tpu.memory_space<vmem>>, vector<1x8x256xf32>
      %69 = vector.shape_cast %68 : vector<1x8x256xf32> to vector<8x256xf32>
      %70 = arith.addi %3, %c4_i32 : i32
      %71 = vector.broadcast %70 : i32 to vector<8x256xi32>
      %72 = arith.cmpi slt, %71, %20 : vector<8x256xi32>
      %73 = arith.truncf %66 : vector<8x256xf32> to vector<8x256xbf16>
      %cst_35 = arith.constant dense<0.000000e+00> : vector<8x256xf32>
      %74 = tpu.matmul %73, %21, %cst_35 {dimension_numbers = #tpu.dot_dimension_numbers<[1], [0], [0], [1], [0, 0, 1, 1], [], []>} : vector<8x256xbf16>, vector<256x256xbf16>, vector<8x256xf32> -> vector<8x256xf32>
      %75 = arith.addf %74, %69 : vector<8x256xf32>
      %76 = math.tanh %75 : vector<8x256xf32>
      %77 = arith.select %72, %76, %66 : vector<8x256xi1>, vector<8x256xf32>
      %c5_i32 = arith.constant 5 : i32
      %78 = arith.index_cast %c5_i32 : i32 to index
      %c0_36 = arith.constant 0 : index
      %c0_37 = arith.constant 0 : index
      %79 = vector.load %arg12[%78, %c0_36, %c0_37] : memref<8x8x256xf32, #tpu.memory_space<vmem>>, vector<1x8x256xf32>
      %80 = vector.shape_cast %79 : vector<1x8x256xf32> to vector<8x256xf32>
      %81 = arith.addi %3, %c5_i32 : i32
      %82 = vector.broadcast %81 : i32 to vector<8x256xi32>
      %83 = arith.cmpi slt, %82, %20 : vector<8x256xi32>
      %84 = arith.truncf %77 : vector<8x256xf32> to vector<8x256xbf16>
      %cst_38 = arith.constant dense<0.000000e+00> : vector<8x256xf32>
      %85 = tpu.matmul %84, %21, %cst_38 {dimension_numbers = #tpu.dot_dimension_numbers<[1], [0], [0], [1], [0, 0, 1, 1], [], []>} : vector<8x256xbf16>, vector<256x256xbf16>, vector<8x256xf32> -> vector<8x256xf32>
      %86 = arith.addf %85, %80 : vector<8x256xf32>
      %87 = math.tanh %86 : vector<8x256xf32>
      %88 = arith.select %83, %87, %77 : vector<8x256xi1>, vector<8x256xf32>
      %c6_i32 = arith.constant 6 : i32
      %89 = arith.index_cast %c6_i32 : i32 to index
      %c0_39 = arith.constant 0 : index
      %c0_40 = arith.constant 0 : index
      %90 = vector.load %arg12[%89, %c0_39, %c0_40] : memref<8x8x256xf32, #tpu.memory_space<vmem>>, vector<1x8x256xf32>
      %91 = vector.shape_cast %90 : vector<1x8x256xf32> to vector<8x256xf32>
      %92 = arith.addi %3, %c6_i32 : i32
      %93 = vector.broadcast %92 : i32 to vector<8x256xi32>
      %94 = arith.cmpi slt, %93, %20 : vector<8x256xi32>
      %95 = arith.truncf %88 : vector<8x256xf32> to vector<8x256xbf16>
      %cst_41 = arith.constant dense<0.000000e+00> : vector<8x256xf32>
      %96 = tpu.matmul %95, %21, %cst_41 {dimension_numbers = #tpu.dot_dimension_numbers<[1], [0], [0], [1], [0, 0, 1, 1], [], []>} : vector<8x256xbf16>, vector<256x256xbf16>, vector<8x256xf32> -> vector<8x256xf32>
      %97 = arith.addf %96, %91 : vector<8x256xf32>
      %98 = math.tanh %97 : vector<8x256xf32>
      %99 = arith.select %94, %98, %88 : vector<8x256xi1>, vector<8x256xf32>
      %c7_i32 = arith.constant 7 : i32
      %100 = arith.index_cast %c7_i32 : i32 to index
      %c0_42 = arith.constant 0 : index
      %c0_43 = arith.constant 0 : index
      %101 = vector.load %arg12[%100, %c0_42, %c0_43] : memref<8x8x256xf32, #tpu.memory_space<vmem>>, vector<1x8x256xf32>
      %102 = vector.shape_cast %101 : vector<1x8x256xf32> to vector<8x256xf32>
      %103 = arith.addi %3, %c7_i32 : i32
      %104 = vector.broadcast %103 : i32 to vector<8x256xi32>
      %105 = arith.cmpi slt, %104, %20 : vector<8x256xi32>
      %106 = arith.truncf %99 : vector<8x256xf32> to vector<8x256xbf16>
      %cst_44 = arith.constant dense<0.000000e+00> : vector<8x256xf32>
      %107 = tpu.matmul %106, %21, %cst_44 {dimension_numbers = #tpu.dot_dimension_numbers<[1], [0], [0], [1], [0, 0, 1, 1], [], []>} : vector<8x256xbf16>, vector<256x256xbf16>, vector<8x256xf32> -> vector<8x256xf32>
      %108 = arith.addf %107, %102 : vector<8x256xf32>
      %109 = math.tanh %108 : vector<8x256xf32>
      %110 = arith.select %105, %109, %99 : vector<8x256xi1>, vector<8x256xf32>
      %c8_i32_45 = arith.constant 8 : i32
      %c0_46 = arith.constant 0 : index
      %c0_47 = arith.constant 0 : index
      %111 = vector.load %arg11[%c0_46, %c0_47] : memref<8x256xf32, #tpu.memory_space<vmem>>, vector<8x256xf32>
      tpu.vector_store %arg11[%c0_46, %c0_47], %110 {strides = array<i32>} : memref<8x256xf32, #tpu.memory_space<vmem>>, vector<8x256xf32>,
    } else {
    }
    %c0_i32_2 = arith.constant 0 : i32
    %8 = arith.cmpi eq, %arg1, %c0_i32_2 : i32
    %9 = arith.extui %8 : i1 to i32
    %c0_i32_3 = arith.constant 0 : i32
    %10 = arith.cmpi ne, %9, %c0_i32_3 : i32
    scf.if %10 {
      %c0_4 = arith.constant 0 : index
      %c0_5 = arith.constant 0 : index
      %11 = vector.load %arg11[%c0_4, %c0_5] : memref<8x256xf32, #tpu.memory_space<vmem>>, vector<8x256xf32>
      %c0_6 = arith.constant 0 : index
      %c0_7 = arith.constant 0 : index
      %12 = vector.load %arg8[%c0_6, %c0_7] : memref<256x128xf32, #tpu.memory_space<vmem>>, vector<256x128xf32>
      %cst = arith.constant dense<0.000000e+00> : vector<8x128xf32>
      %13 = tpu.matmul %11, %12, %cst {dimension_numbers = #tpu.dot_dimension_numbers<[1], [0], [0], [1], [0, 0, 1, 1], [], []>} : vector<8x256xf32>, vector<256x128xf32>, vector<8x128xf32> -> vector<8x128xf32>
      %c0_8 = arith.constant 0 : index
      %c0_9 = arith.constant 0 : index
      %14 = vector.load %arg9[%c0_8, %c0_9] : memref<1x128xf32, #tpu.memory_space<vmem>>, vector<1x128xf32>
      %15 = vector.broadcast %14 : vector<1x128xf32> to vector<8x128xf32>
      %16 = arith.addf %13, %15 : vector<8x128xf32>
      %c0_10 = arith.constant 0 : index
      %c0_11 = arith.constant 0 : index
      %17 = vector.load %arg10[%c0_10, %c0_11] : memref<8x128xf32, #tpu.memory_space<vmem>>, vector<8x128xf32>
      tpu.vector_store %arg10[%c0_10, %c0_11], %16 {strides = array<i32>} : memref<8x128xf32, #tpu.memory_space<vmem>>, vector<8x128xf32>,
    } else {
    }
    return
  }
  func.func @transform_0(%arg0: i32, %arg1: i32, %arg2: memref<1xi32, #tpu.memory_space<smem>>) -> (i32, i32) {
    %c0_i32 = arith.constant 0 : i32
    %c0_i32_0 = arith.constant 0 : i32
    return %arg0, %c0_i32 : i32, i32
  }
  func.func @transform_1(%arg0: i32, %arg1: i32, %arg2: memref<1xi32, #tpu.memory_space<smem>>) -> (i32, i32, i32) {
    %c0_i32 = arith.constant 0 : i32
    %c0_i32_0 = arith.constant 0 : i32
    return %arg1, %arg0, %c0_i32 : i32, i32, i32
  }
  func.func @transform_2(%arg0: i32, %arg1: i32, %arg2: memref<1xi32, #tpu.memory_space<smem>>) -> (i32, i32) {
    %c0_i32 = arith.constant 0 : i32
    %c0_i32_0 = arith.constant 0 : i32
    %c0_i32_1 = arith.constant 0 : i32
    return %c0_i32, %c0_i32_0 : i32, i32
  }
  func.func @transform_3(%arg0: i32, %arg1: i32, %arg2: memref<1xi32, #tpu.memory_space<smem>>) -> (i32, i32) {
    %c0_i32 = arith.constant 0 : i32
    %c0_i32_0 = arith.constant 0 : i32
    %c0_i32_1 = arith.constant 0 : i32
    return %c0_i32, %c0_i32_0 : i32, i32
  }
  func.func @transform_4(%arg0: i32, %arg1: i32, %arg2: memref<1xi32, #tpu.memory_space<smem>>) -> (i32, i32) {
    %c0_i32 = arith.constant 0 : i32
    %c0_i32_0 = arith.constant 0 : i32
    %c0_i32_1 = arith.constant 0 : i32
    return %c0_i32, %c0_i32_0 : i32, i32
  }
  func.func @transform_5(%arg0: i32, %arg1: i32, %arg2: memref<1xi32, #tpu.memory_space<smem>>) -> (i32, i32) {
    %c0_i32 = arith.constant 0 : i32
    %c0_i32_0 = arith.constant 0 : i32
    %c0_i32_1 = arith.constant 0 : i32
    return %c0_i32, %c0_i32_0 : i32, i32
  }
  func.func @transform_6(%arg0: i32, %arg1: i32, %arg2: memref<1xi32, #tpu.memory_space<smem>>) -> (i32, i32) {
    %c0_i32 = arith.constant 0 : i32
    %c0_i32_0 = arith.constant 0 : i32
    %c0_i32_1 = arith.constant 0 : i32
    return %c0_i32, %c0_i32_0 : i32, i32
  }
  func.func @transform_7(%arg0: i32, %arg1: i32, %arg2: memref<1xi32, #tpu.memory_space<smem>>) -> (i32, i32) {
    %c0_i32 = arith.constant 0 : i32
    %c0_i32_0 = arith.constant 0 : i32
    return %arg0, %c0_i32 : i32, i32
  }
}

</mosaic_0001>

<bundles_post_ra>
// kernel: rnn_forward.1
= control target key start
LH: loop header
LB: loop body
LE: loop exit
PB: predicated region body
PF: predicated region fallthrough
CT: control target
= control target key end

     0   :  { %v1198_v0 = vmov 0.0   ;;  %s2098_s0 = inlined_call_operand.<no memory space> [shape: s32[1], index: 0, kind: input, shape index: {}]   ;;  %s2099_s1 = inlined_call_operand.vmem [shape: s32[8,256], index: 1, kind: input, shape index: {}]   ;;  %s2100_s2 = inlined_call_operand.vmem [shape: f32[8,8,128], index: 2, kind: input, shape index: {}]   ;;  %s2101_s3 = inlined_call_operand.vmem [shape: f32[128,256], index: 3, kind: input, shape index: {}]   ;;  %s2102_s4 = inlined_call_operand.vmem [shape: f32[1,256], index: 4, kind: input, shape index: {}]   ;;  %s2103_s5 = inlined_call_operand.vmem [shape: bf16[256,256], index: 5, kind: input, shape index: {}]   ;;  %s2104_s6 = inlined_call_operand.vmem [shape: f32[256,128], index: 6, kind: input, shape index: {}]   ;;  %s2105_s7 = inlined_call_operand.vmem [shape: f32[1,128], index: 7, kind: input, shape index: {}]   ;;  %s2106_s8 = inlined_call_operand.vmem [shape: f32[8,128], index: 8, kind: output, shape index: {}]  }
   0x1   :  { %32 = vst [vmem:[#allocation2] sm:$0xff] %v1198_v0  ;;  %p987_p0 = scmp.le.s32.totalorder %s2098_s0, 0 }
   0x2   :  { %33 = vst [vmem:[#allocation2 + $0x8] sm:$0xff] %v1198_v0 }
   0x3   :  { %39 = sbr.rel (%p987_p0) target bundleno = 1227 (0x4cb), region = 37 }
   0x8   :  { %v1048_v1 = vld [vmem:[%s2103_s5 + $0x70] sm:$0xf]  ;;  %v1147_v2 = vld [vmem:[%s2103_s5 + $0x74] sm:$0xf0]  ;;  %v1040_v7 = vld [vmem:[%s2103_s5 + $0x60] sm:$0xf] }
   0x9   :  { %v1112_v3 = vld [vmem:[%s2103_s5 + $0xf0] sm:$0xf]  ;;  %v1256_v4 = vor.u32 %v1147_v2, %v1048_v1  ;;  %v1163_v5 = vld [vmem:[%s2103_s5 + $0xf4] sm:$0xf0]  ;;  %v1145_v9 = vld [vmem:[%s2103_s5 + $0x64] sm:$0xf0] }
   0xa   :  { %v78_v6 = vld [vmem:[%s2101_s3 + $0xf0] sm:$0xff]  ;;  %v1267_v8 = vor.u32 %v1163_v5, %v1112_v3  ;;  %v1104_v10 = vld [vmem:[%s2103_s5 + $0xe0] sm:$0xf]  ;;  %v1161_v11 = vld [vmem:[%s2103_s5 + $0xe4] sm:$0xf0]  ;;  %v1279_v12 = vor.u32 %v1145_v9, %v1040_v7 }
   0xb   :  { %86 = vmatpush.msra.mxu0 %v78_v6  ;;  %387 = vmatpush.bf16.msra.mxu2 %v1256_v4  ;;  %v76_v13 = vld [vmem:[%s2101_s3 + $0xe0] sm:$0xff]  ;;  %v74_v14 = vld [vmem:[%s2101_s3 + $0xd0] sm:$0xff]  ;;  %v1288_v15 = vor.u32 %v1161_v11, %v1104_v10  ;;  %v1143_v17 = vld [vmem:[%s2103_s5 + $0x54] sm:$0xf0] }
   0xc   :  { %400 = vmatpush.bf16.msra.mxu3 %v1267_v8  ;;  %v1032_v16 = vld [vmem:[%s2103_s5 + $0x50] sm:$0xf]  ;;  %v1159_v19 = vld [vmem:[%s2103_s5 + $0xd4] sm:$0xf0]  ;;  %v72_v20 = vld [vmem:[%s2101_s3 + $0xc0] sm:$0xff] }
   0xd   :  { %87 = vmatpush.msra.mxu0 %v76_v13  ;;  %v1096_v18 = vld [vmem:[%s2103_s5 + $0xd0] sm:$0xf]  ;;  %v1306_v21 = vor.u32 %v1143_v17, %v1032_v16  ;;  %v1024_v24 = vld [vmem:[%s2103_s5 + $0x40] sm:$0xf]  ;;  %v1141_v25 = vld [vmem:[%s2103_s5 + $0x44] sm:$0xf0] }
   0xe   :  { %v70_v22 = vld [vmem:[%s2101_s3 + $0xb0] sm:$0xff]  ;;  %v1312_v23 = vor.u32 %v1159_v19, %v1096_v18  ;;  %v1088_v26 = vld [vmem:[%s2103_s5 + $0xc0] sm:$0xf]  ;;  %v1157_v27 = vld [vmem:[%s2103_s5 + $0xc4] sm:$0xf0]  ;;  %v1330_v29 = vor.u32 %v1141_v25, %v1024_v24 }
   0xf   :  { %88 = vmatpush.msra.mxu0 %v74_v14  ;;  %388 = vmatpush.bf16.msra.mxu2 %v1279_v12  ;;  %v68_v28 = vld [vmem:[%s2101_s3 + $0xa0] sm:$0xff]  ;;  %v66_v30 = vld [vmem:[%s2101_s3 + $0x90] sm:$0xff]  ;;  %v1336_v31 = vor.u32 %v1157_v27, %v1088_v26  ;;  %v1139_v33 = vld [vmem:[%s2103_s5 + $0x34] sm:$0xf0] }
  0x10   :  { %401 = vmatpush.bf16.msra.mxu3 %v1288_v15  ;;  %v1016_v32 = vld [vmem:[%s2103_s5 + $0x30] sm:$0xf]  ;;  %v1155_v35 = vld [vmem:[%s2103_s5 + $0xb4] sm:$0xf0]  ;;  %v64_v36 = vld [vmem:[%s2101_s3 + $0x80] sm:$0xff] }
  0x11   :  { %89 = vmatpush.msra.mxu0 %v72_v20  ;;  %v1080_v34 = vld [vmem:[%s2103_s5 + $0xb0] sm:$0xf]  ;;  %v1354_v37 = vor.u32 %v1139_v33, %v1016_v32  ;;  %v1008_v40 = vld [vmem:[%s2103_s5 + $0x20] sm:$0xf]  ;;  %v1137_v41 = vld [vmem:[%s2103_s5 + $0x24] sm:$0xf0] }
  0x12   :  { %v62_v38 = vld [vmem:[%s2101_s3 + $0x70] sm:$0xff]  ;;  %v1360_v39 = vor.u32 %v1155_v35, %v1080_v34  ;;  %v1072_v42 = vld [vmem:[%s2103_s5 + $0xa0] sm:$0xf]  ;;  %v1153_v43 = vld [vmem:[%s2103_s5 + $0xa4] sm:$0xf0]  ;;  %v1381_v46 = vor.u32 %v1137_v41, %v1008_v40 }
  0x13   :  { %90 = vmatpush.msra.mxu0 %v70_v22  ;;  %389 = vmatpush.bf16.msra.mxu2 %v1306_v21  ;;  %v60_v44 = vld [vmem:[%s2101_s3 + $0x60] sm:$0xff]  ;;  %v79_v45 = vld [vmem:[%s2101_s3 + $0xf8] sm:$0xff]  ;;  %v58_v47 = vld [vmem:[%s2101_s3 + $0x50] sm:$0xff]  ;;  %v1390_v49 = vor.u32 %v1153_v43, %v1072_v42 }
  0x14   :  { %402 = vmatpush.bf16.msra.mxu3 %v1312_v23  ;;  %127 = vmatpush.msra.mxu1 %v79_v45  ;;  %v1000_v48 = vld [vmem:[%s2103_s5 + $0x10] sm:$0xf]  ;;  %v1135_v50 = vld [vmem:[%s2103_s5 + $0x14] sm:$0xf0]  ;;  %v77_v51 = vld [vmem:[%s2101_s3 + $0xe8] sm:$0xff] }
  0x15   :  { %91 = vmatpush.msra.mxu0 %v68_v28  ;;  %v75_v52 = vld [vmem:[%s2101_s3 + $0xd8] sm:$0xff]  ;;  %v1064_v53 = vld [vmem:[%s2103_s5 + $0x90] sm:$0xf]  ;;  %v56_v55 = vld [vmem:[%s2101_s3 + $0x40] sm:$0xff]  ;;  %v1414_v57 = vor.u32 %v1135_v50, %v1000_v48 }
  0x16   :  { %v1151_v54 = vld [vmem:[%s2103_s5 + $0x94] sm:$0xf0]  ;;  %128 = vmatpush.msra.mxu1 %v77_v51  ;;  %v73_v56 = vld [vmem:[%s2101_s3 + $0xc8] sm:$0xff]  ;;  %v54_v58 = vld [vmem:[%s2101_s3 + $0x30] sm:$0xff] }
  0x17   :  { %92 = vmatpush.msra.mxu0 %v66_v30  ;;  %390 = vmatpush.bf16.msra.mxu2 %v1330_v29  ;;  %v992_v59 = vld [vmem:[%s2103_s5] sm:$0xf]  ;;  %v1133_v60 = vld [vmem:[%s2103_s5 + $0x4] sm:$0xf0]  ;;  %v1426_v61 = vor.u32 %v1151_v54, %v1064_v53  ;;  %v71_v0 = vld [vmem:[%s2101_s3 + $0xb8] sm:$0xff] }
  0x18   :  { %403 = vmatpush.bf16.msra.mxu3 %v1336_v31  ;;  %129 = vmatpush.msra.mxu1 %v75_v52  ;;  %v1056_v62 = vld [vmem:[%s2103_s5 + $0x80] sm:$0xf]  ;;  %v1149_v63 = vld [vmem:[%s2103_s5 + $0x84] sm:$0xf0]  ;;  %v1146_v1 = vld [vmem:[%s2103_s5 + $0x74] sm:$0xf]  ;;  %v1456_v9 = vor.u32 %v1133_v60, %v992_v59 }
  0x19   :  { %93 = vmatpush.msra.mxu0 %v64_v36  ;;  %v1050_v2 = vld [vmem:[%s2103_s5 + $0x78] sm:$0xf0]  ;;  %v52_v3 = vld [vmem:[%s2101_s3 + $0x20] sm:$0xff]  ;;  %v1162_v5 = vld [vmem:[%s2103_s5 + $0xf4] sm:$0xf]  ;;  %v1464_v13 = vor.u32 %v1149_v63, %v1056_v62 }
  0x1a   :  { %130 = vmatpush.msra.mxu1 %v73_v56  ;;  %v1114_v6 = vld [vmem:[%s2103_s5 + $0xf8] sm:$0xf0]  ;;  %v69_v7 = vld [vmem:[%s2101_s3 + $0xa8] sm:$0xff]  ;;  %v1458_v10 = vld [vmem:[#allocation2] sm:$0xff]  ;;  %v1466_v14 = vor.u32 %v1146_v1, %v1050_v2 }
  0x1b   :  { %94 = vmatpush.msra.mxu0 %v62_v38  ;;  %391 = vmatpush.bf16.msra.mxu2 %v1354_v37  ;;  %v50_v11 = vld [vmem:[%s2101_s3 + $0x10] sm:$0xff]  ;;  %v1468_v16 = vld [vmem:[#allocation2 + $0x8] sm:$0xff]  ;;  %v67_v17 = vld [vmem:[%s2101_s3 + $0x98] sm:$0xff]  ;;  %v1473_v18 = vor.u32 %v1162_v5, %v1114_v6  ;;  %v1483_v22 = vpack.c.bf16 %v1458_v10, %v1458_v10 }
  0x1c   :  { %404 = vmatpush.bf16.msra.mxu3 %v1360_v39  ;;  %131 = vmatpush.msra.mxu1 %v71_v0  ;;  %v1144_v19 = vld [vmem:[%s2103_s5 + $0x64] sm:$0xf]  ;;  %v1042_v20 = vld [vmem:[%s2103_s5 + $0x68] sm:$0xf0]  ;;  %v1497_v27 = vpack.c.bf16 %v1468_v16, %v1468_v16  ;;  %v1142_v34 = vld [vmem:[%s2103_s5 + $0x54] sm:$0xf] }
  0x1d   :  { %95 = vmatpush.msra.mxu0 %v60_v44  ;;  %v1160_v24 = vld [vmem:[%s2103_s5 + $0xe4] sm:$0xf]  ;;  %v1106_v25 = vld [vmem:[%s2103_s5 + $0xe8] sm:$0xf0]  ;;  %v1506_v30 = vor.u32 %v1144_v19, %v1042_v20  ;;  %v1034_v35 = vld [vmem:[%s2103_s5 + $0x58] sm:$0xf0] }
  0x1e   :  { %132 = vmatpush.msra.mxu1 %v69_v7  ;;  %v48_v26 = vld [vmem:[%s2101_s3] sm:$0xff]  ;;  %v65_v32 = vld [vmem:[%s2101_s3 + $0x88] sm:$0xff]  ;;  %v1512_v33 = vor.u32 %v1160_v24, %v1106_v25  ;;  %v1158_v36 = vld [vmem:[%s2103_s5 + $0xd4] sm:$0xf]  ;;  %v1533_v41 = vor.u32 %v1142_v34, %v1034_v35 }
  0x1f   :  { %96 = vmatpush.msra.mxu0 %v58_v47  ;;  %392 = vmatpush.bf16.msra.mxu2 %v1381_v46  ;;  %v1502_v28 = vld [vmem:[%s2100_s2] sm:$0xff]  ;;  %v1098_v38 = vld [vmem:[%s2103_s5 + $0xd8] sm:$0xf0]  ;;  %v61_v42 = vld [vmem:[%s2101_s3 + $0x68] sm:$0xff] }
  0x20   :  { %405 = vmatpush.bf16.msra.mxu3 %v1390_v49  ;;  %133 = vmatpush.msra.mxu1 %v67_v17  ;;  %v63_v40 = vld [vmem:[%s2101_s3 + $0x78] sm:$0xff]  ;;  %v1540_v43 = vor.u32 %v1158_v36, %v1098_v38  ;;  %v1140_v44 = vld [vmem:[%s2103_s5 + $0x44] sm:$0xf]  ;;  %v1026_v45 = vld [vmem:[%s2103_s5 + $0x48] sm:$0xf0] }
  0x21   :  { %97 = vmatpush.msra.mxu0 %v56_v55  ;;  %v1156_v47 = vld [vmem:[%s2103_s5 + $0xc4] sm:$0xf]  ;;  %v1090_v48 = vld [vmem:[%s2103_s5 + $0xc8] sm:$0xf0]  ;;  %v59_v50 = vld [vmem:[%s2101_s3 + $0x58] sm:$0xff]  ;;  %v1561_v52 = vor.u32 %v1140_v44, %v1026_v45 }
  0x22   :  { %134 = vmatpush.msra.mxu1 %v65_v32  ;;  %v41_v51 = vld [vmem:[%s2100_s2 + $0x8] sm:$0xff]  ;;  %v1568_v54 = vor.u32 %v1156_v47, %v1090_v48  ;;  %v1138_v55 = vld [vmem:[%s2103_s5 + $0x34] sm:$0xf]  ;;  %v1018_v56 = vld [vmem:[%s2103_s5 + $0x38] sm:$0xf0] }
  0x23   :  { %98 = vmatpush.msra.mxu0 %v54_v58  ;;  %393 = vmatpush.bf16.msra.mxu2 %v1414_v57  ;;  %v57_v53 = vld [vmem:[%s2101_s3 + $0x48] sm:$0xff]  ;;  %v1154_v58 = vld [vmem:[%s2103_s5 + $0xb4] sm:$0xf]  ;;  %v1082_v59 = vld [vmem:[%s2103_s5 + $0xb8] sm:$0xf0]  ;;  %v1586_v62 = vor.u32 %v1138_v55, %v1018_v56 }
  0x24   :  { %406 = vmatpush.bf16.msra.mxu3 %v1426_v61  ;;  %135 = vmatpush.msra.mxu1 %v63_v40  ;;  %v55_v60 = vld [vmem:[%s2101_s3 + $0x38] sm:$0xff]  ;;  %v53_v63 = vld [vmem:[%s2101_s3 + $0x28] sm:$0xff]  ;;  %v1593_v0 = vor.u32 %v1154_v58, %v1082_v59  ;;  %v1136_v1 = vld [vmem:[%s2103_s5 + $0x24] sm:$0xf] }
  0x25   :  { %99 = vmatpush.msra.mxu0 %v52_v3  ;;  %v1010_v2 = vld [vmem:[%s2103_s5 + $0x28] sm:$0xf0]  ;;  %v1152_v3 = vld [vmem:[%s2103_s5 + $0xa4] sm:$0xf]  ;;  %v51_v6 = vld [vmem:[%s2101_s3 + $0x18] sm:$0xff] }
  0x26   :  { %136 = vmatpush.msra.mxu1 %v61_v42  ;;  %v1074_v5 = vld [vmem:[%s2103_s5 + $0xa8] sm:$0xf0]  ;;  %v42_v7 = vld [vmem:[%s2100_s2 + $0x10] sm:$0xff]  ;;  %v1002_v24 = vld [vmem:[%s2103_s5 + $0x18] sm:$0xf0] }
  0x27   :  { %100 = vmatpush.msra.mxu0 %v50_v11  ;;  %394 = vmatpush.bf16.msra.mxu2 %v1456_v9  ;;  %v1614_v11 = vor.u32 %v1136_v1, %v1010_v2  ;;  %v49_v17 = vld [vmem:[%s2101_s3 + $0x8] sm:$0xff]  ;;  %v1621_v19 = vor.u32 %v1152_v3, %v1074_v5  ;;  %v1134_v20 = vld [vmem:[%s2103_s5 + $0x14] sm:$0xf]  ;;  %v1132_v35 = vld [vmem:[%s2103_s5 + $0x4] sm:$0xf] }
  0x28   :  { %407 = vmatpush.bf16.msra.mxu3 %v1464_v13  ;;  %137 = vmatpush.msra.mxu1 %v59_v50  ;;  %v1150_v25 = vld [vmem:[%s2103_s5 + $0x94] sm:$0xf]  ;;  %v1636_v32 = vor.u32 %v1134_v20, %v1002_v24  ;;  %v994_v36 = vld [vmem:[%s2103_s5 + $0x8] sm:$0xf0]  ;;  %v1148_v38 = vld [vmem:[%s2103_s5 + $0x84] sm:$0xf] }
  0x29   :  { %101 = vmatpush.msra.mxu0 %v48_v26  ;;  %v1066_v26 = vld [vmem:[%s2103_s5 + $0x98] sm:$0xf0]  ;;  %v1660_v42 = vor.u32 %v1132_v35, %v994_v36  ;;  %v44_v45 = vld [vmem:[%s2100_s2 + $0x20] sm:$0xff] }
  0x2a   :  { %395 = vmatmul.bf16.vlgmr.msra.gmra.mxu2 %v1483_v22  ;;  %102 = vmatmul.f32.vlgmr.msra.gmra.mxu0 %v1502_v28  ;;  %v1640_v34 = vor.u32 %v1150_v25, %v1066_v26  ;;  %v43_v40 = vld [vmem:[%s2100_s2 + $0x18] sm:$0xff]  ;;  %v80_v48 = vld [vmem:[%s2102_s4] sm:$0x3]  ;;  %v1772_v26 = vld [vmem:[%s2099_s1 + $0x8] sm:$0xff] }
  0x2b   :  { %413 = vmatpush.bf16.msrb.mxu2 %v1466_v14  ;;  %408 = vmatmul.bf16.vlgmr.msra.gmra.mxu3 %v1497_v27  ;;  %v47_v47 = vld [vmem:[%s2100_s2 + $0x38] sm:$0xff]  ;;  %v1742_v50 = vperm.slane %v80_v48, 0  ;;  %vm989_vm1 = vcmp.gt.s32.totalorder %v1772_v26, 0  ;;  %vm1119_vm3 = vcmp.gt.s32.totalorder %v1772_v26, 1  ;;  %vm1121_vm5 = vcmp.gt.s32.totalorder %v1772_v26, 2 }
  0x2c   :  { %426 = vmatpush.bf16.msrb.mxu3 %v1473_v18  ;;  %452 = vmatpush.bf16.msrb.mxu0 %v1256_v4  ;;  %vm1123_vm7 = vcmp.gt.s32.totalorder %v1772_v26, 3  ;;  %vm1125_vm9 = vcmp.gt.s32.totalorder %v1772_v26, 4  ;;  %vm1127_vm11 = vcmp.gt.s32.totalorder %v1772_v26, 5  ;;  %vm1129_vm13 = vcmp.gt.s32.totalorder %v1772_v26, 6 }
  0x2d   :  { %138 = vmatpush.msra.mxu1 %v57_v53  ;;  %vm1131_vm15 = vcmp.gt.s32.totalorder %v1772_v26, 7 }
  0x2f   :  { %414 = vmatpush.bf16.msrb.mxu2 %v1506_v30  ;;  %139 = vmatpush.msra.mxu1 %v55_v60  ;;  %v1748_v60 = vld [vmem:[%s2099_s1] sm:$0xff] }
  0x30   :  { %427 = vmatpush.bf16.msrb.mxu3 %v1512_v33  ;;  %453 = vmatpush.bf16.msrb.mxu0 %v1279_v12  ;;  %vm988_vm0 = vcmp.gt.s32.totalorder %v1748_v60, 0  ;;  %vm1118_vm2 = vcmp.gt.s32.totalorder %v1748_v60, 1  ;;  %vm1120_vm4 = vcmp.gt.s32.totalorder %v1748_v60, 2  ;;  %vm1122_vm6 = vcmp.gt.s32.totalorder %v1748_v60, 3 }
  0x31   :  { %140 = vmatpush.msra.mxu1 %v53_v63  ;;  %vm1124_vm8 = vcmp.gt.s32.totalorder %v1748_v60, 4  ;;  %vm1126_vm10 = vcmp.gt.s32.totalorder %v1748_v60, 5  ;;  %vm1128_vm12 = vcmp.gt.s32.totalorder %v1748_v60, 6  ;;  %vm1130_vm14 = vcmp.gt.s32.totalorder %v1748_v60, 7 }
  0x32   :  { %105 = vmatmul.f32.gmra.mxu0 %v41_v51 }
  0x33   :  { %415 = vmatpush.bf16.msrb.mxu2 %v1533_v41  ;;  %141 = vmatpush.msra.mxu1 %v51_v6  ;;  %v1760_v6 = vperm.slane %v80_v48, 1 }
  0x34   :  { %428 = vmatpush.bf16.msrb.mxu3 %v1540_v43  ;;  %454 = vmatpush.bf16.msrb.mxu0 %v1306_v21 }
  0x35   :  { %142 = vmatpush.msra.mxu1 %v49_v17 }
  0x36   :  { %143 = vmatmul.f32.vlgmr.msra.gmra.mxu1 %v1502_v28  ;;  %v1058_v28 = vld [vmem:[%s2103_s5 + $0x88] sm:$0xf0] }
  0x37   :  { %416 = vmatpush.bf16.msrb.mxu2 %v1561_v52  ;;  %465 = vmatpush.bf16.msrb.mxu1 %v1267_v8  ;;  %v1663_v44 = vor.u32 %v1148_v38, %v1058_v28 }
  0x38   :  { %429 = vmatpush.bf16.msrb.mxu3 %v1568_v54  ;;  %455 = vmatpush.bf16.msrb.mxu0 %v1330_v29 }
  0x3a   :  { %108 = vmatmul.f32.gmra.mxu0 %v42_v7 }
  0x3b   :  { %417 = vmatpush.bf16.msrb.mxu2 %v1586_v62  ;;  %466 = vmatpush.bf16.msrb.mxu1 %v1288_v15 }
  0x3c   :  { %430 = vmatpush.bf16.msrb.mxu3 %v1593_v0  ;;  %456 = vmatpush.bf16.msrb.mxu0 %v1354_v37 }
  0x3e   :  { %146 = vmatmul.f32.gmra.mxu1 %v41_v51 }
  0x3f   :  { %418 = vmatpush.bf16.msrb.mxu2 %v1614_v11  ;;  %467 = vmatpush.bf16.msrb.mxu1 %v1312_v23 }
  0x40   :  { %431 = vmatpush.bf16.msrb.mxu3 %v1621_v19  ;;  %457 = vmatpush.bf16.msrb.mxu0 %v1381_v46 }
  0x42   :  { %111 = vmatmul.f32.gmra.mxu0 %v43_v40 }
  0x43   :  { %419 = vmatpush.bf16.msrb.mxu2 %v1636_v32  ;;  %468 = vmatpush.bf16.msrb.mxu1 %v1336_v31 }
  0x44   :  { %432 = vmatpush.bf16.msrb.mxu3 %v1640_v34  ;;  %458 = vmatpush.bf16.msrb.mxu0 %v1414_v57 }
  0x46   :  { %149 = vmatmul.f32.gmra.mxu1 %v42_v7 }
  0x47   :  { %420 = vmatpush.bf16.msrb.mxu2 %v1660_v42  ;;  %469 = vmatpush.bf16.msrb.mxu1 %v1360_v39 }
  0x48   :  { %433 = vmatpush.bf16.msrb.mxu3 %v1663_v44  ;;  %459 = vmatpush.bf16.msrb.mxu0 %v1456_v9 }
  0x4a   :  { %421 = vmatmul.bf16.vlgmr.msrb.gmra.mxu2 %v1483_v22  ;;  %114 = vmatmul.f32.gmra.mxu0 %v44_v45  ;;  %v45_v22 = vld [vmem:[%s2100_s2 + $0x28] sm:$0xff] }
  0x4b   :  { %478 = vmatpush.bf16.msra.mxu2 %v1466_v14  ;;  %434 = vmatmul.bf16.vlgmr.msrb.gmra.mxu3 %v1497_v27  ;;  %v46_v27 = vld [vmem:[%s2100_s2 + $0x30] sm:$0xff] }
  0x4c   :  { %491 = vmatpush.bf16.msra.mxu3 %v1473_v18  ;;  %517 = vmatpush.bf16.msra.mxu0 %v1256_v4 }
  0x4d   :  { %470 = vmatpush.bf16.msrb.mxu1 %v1390_v49 }
  0x4e   :  { %152 = vmatmul.f32.gmra.mxu1 %v43_v40 }
  0x4f   :  { %479 = vmatpush.bf16.msra.mxu2 %v1506_v30 }
  0x50   :  { %492 = vmatpush.bf16.msra.mxu3 %v1512_v33  ;;  %518 = vmatpush.bf16.msra.mxu0 %v1279_v12 }
  0x51   :  { %471 = vmatpush.bf16.msrb.mxu1 %v1426_v61 }
  0x52   :  { %117 = vmatmul.f32.gmra.mxu0 %v45_v22 }
  0x53   :  { %480 = vmatpush.bf16.msra.mxu2 %v1533_v41 }
  0x54   :  { %493 = vmatpush.bf16.msra.mxu3 %v1540_v43  ;;  %519 = vmatpush.bf16.msra.mxu0 %v1306_v21 }
  0x55   :  { %472 = vmatpush.bf16.msrb.mxu1 %v1464_v13 }
  0x56   :  { %155 = vmatmul.f32.gmra.mxu1 %v44_v45 }
  0x57   :  { %481 = vmatpush.bf16.msra.mxu2 %v1561_v52 }
  0x58   :  { %494 = vmatpush.bf16.msra.mxu3 %v1568_v54  ;;  %520 = vmatpush.bf16.msra.mxu0 %v1330_v29 }
  0x59   :  { %530 = vmatpush.bf16.msra.mxu1 %v1267_v8 }
  0x5a   :  { %120 = vmatmul.f32.gmra.mxu0 %v46_v27 }
  0x5b   :  { %482 = vmatpush.bf16.msra.mxu2 %v1586_v62 }
  0x5c   :  { %495 = vmatpush.bf16.msra.mxu3 %v1593_v0  ;;  %521 = vmatpush.bf16.msra.mxu0 %v1354_v37 }
  0x5d   :  { %531 = vmatpush.bf16.msra.mxu1 %v1288_v15 }
  0x5e   :  { %158 = vmatmul.f32.gmra.mxu1 %v45_v22 }
  0x5f   :  { %483 = vmatpush.bf16.msra.mxu2 %v1614_v11 }
  0x60   :  { %496 = vmatpush.bf16.msra.mxu3 %v1621_v19  ;;  %522 = vmatpush.bf16.msra.mxu0 %v1381_v46 }
  0x61   :  { %532 = vmatpush.bf16.msra.mxu1 %v1312_v23 }
  0x62   :  { %123 = vmatmul.f32.gmra.mxu0 %v47_v47 }
  0x63   :  { %484 = vmatpush.bf16.msra.mxu2 %v1636_v32 }
  0x64   :  { %497 = vmatpush.bf16.msra.mxu3 %v1640_v34  ;;  %523 = vmatpush.bf16.msra.mxu0 %v1414_v57 }
  0x65   :  { %533 = vmatpush.bf16.msra.mxu1 %v1336_v31 }
  0x66   :  { %161 = vmatmul.f32.gmra.mxu1 %v46_v27 }
  0x67   :  { %485 = vmatpush.bf16.msra.mxu2 %v1660_v42 }
  0x68   :  { %498 = vmatpush.bf16.msra.mxu3 %v1663_v44  ;;  %524 = vmatpush.bf16.msra.mxu0 %v1456_v9 }
  0x69   :  { %534 = vmatpush.bf16.msra.mxu1 %v1360_v39 }
  0x6b   :  { %543 = vmatpush.bf16.msrb.mxu2 %v1466_v14 }
  0x6c   :  { %556 = vmatpush.bf16.msrb.mxu3 %v1473_v18 }
  0x6d   :  { %535 = vmatpush.bf16.msra.mxu1 %v1390_v49 }
  0x6e   :  { %164 = vmatmul.f32.gmra.mxu1 %v47_v47 }
  0x6f   :  { %544 = vmatpush.bf16.msrb.mxu2 %v1506_v30 }
  0x70   :  { %557 = vmatpush.bf16.msrb.mxu3 %v1512_v33 }
  0x71   :  { %536 = vmatpush.bf16.msra.mxu1 %v1426_v61 }
  0x73   :  { %545 = vmatpush.bf16.msrb.mxu2 %v1533_v41 }
  0x74   :  { %558 = vmatpush.bf16.msrb.mxu3 %v1540_v43 }
  0x75   :  { %537 = vmatpush.bf16.msra.mxu1 %v1464_v13 }
  0x77   :  { %546 = vmatpush.bf16.msrb.mxu2 %v1561_v52 }
  0x78   :  { %559 = vmatpush.bf16.msrb.mxu3 %v1568_v54 }
  0x7b   :  { %547 = vmatpush.bf16.msrb.mxu2 %v1586_v62 }
  0x7c   :  { %560 = vmatpush.bf16.msrb.mxu3 %v1593_v0 }
  0x7f   :  { %548 = vmatpush.bf16.msrb.mxu2 %v1614_v11 }
  0x80   :  { %561 = vmatpush.bf16.msrb.mxu3 %v1621_v19 }
  0x83   :  { %549 = vmatpush.bf16.msrb.mxu2 %v1636_v32 }
  0x84   :  { %562 = vmatpush.bf16.msrb.mxu3 %v1640_v34 }
  0x87   :  { %550 = vmatpush.bf16.msrb.mxu2 %v1660_v42 }
  0x88   :  { %563 = vmatpush.bf16.msrb.mxu3 %v1663_v44 }
  0xa7   :  { %v103_v51 = vpop.f32.mrf.mxu0 }
  0xa8   :  { %v104_v53 = vadd.f32 %v103_v51, %v1742_v50 }
  0xad   :  { %v396_v55 = vpop.f32.mrf.mxu2 }
  0xae   :  { %v397_v56 = vadd.f32 %v396_v55, %v104_v53  ;;  %v409_v58 = vpop.f32.mrf.mxu3 }
  0xb0   :  { %v410_v59 = vadd.f32 %v409_v58, %v397_v56 }
  0xb2   :  { %1165 = vtanh.f32 %v410_v59 }
  0xb3   :  { %v144_v7 = vpop.f32.mrf.mxu1 }
  0xb5   :  { %v398_v63 = vpop.f32.mrf.mxu2 }
  0xb6   :  { %v411_v1 = vpop.f32.mrf.mxu3 }
  0xb8   :  { %v1166_v2 = vpop.eup %1165 }
  0xb9   :  { %v1752_v3 = vsel %vm988_vm0, %v1166_v2, %v1458_v10  ;;  %v145_v10 = vadd.f32 %v144_v7, %v1760_v6 }
  0xba   :  { %v450_v5 = vpack.c.bf16 %v1752_v3, %v1752_v3 }
  0xbb   :  { %v147_v27 = vpop.f32.mrf.mxu1 }
  0xbc   :  { %460 = vmatmul.bf16.vlgmr.msrb.gmra.mxu0 %v450_v5  ;;  %486 = vmatmul.bf16.vlgmr.msra.gmra.mxu2 %v450_v5 }
  0xbd   :  { %582 = vmatpush.bf16.msrb.mxu0 %v1256_v4  ;;  %608 = vmatpush.bf16.msra.mxu2 %v1466_v14 }
  0xc1   :  { %583 = vmatpush.bf16.msrb.mxu0 %v1279_v12  ;;  %609 = vmatpush.bf16.msra.mxu2 %v1506_v30 }
  0xc3   :  { %v1808_v48 = vpop.f32.mrf.mxu1 }
  0xc5   :  { %584 = vmatpush.bf16.msrb.mxu0 %v1306_v21  ;;  %610 = vmatpush.bf16.msra.mxu2 %v1533_v41 }
  0xc9   :  { %585 = vmatpush.bf16.msrb.mxu0 %v1330_v29  ;;  %611 = vmatpush.bf16.msra.mxu2 %v1561_v52 }
  0xcb   :  { %v1812_v53 = vpop.f32.mrf.mxu1 }
  0xcd   :  { %v422_v17 = vpop.f32.mrf.mxu2  ;;  %586 = vmatpush.bf16.msrb.mxu0 %v1354_v37  ;;  %612 = vmatpush.bf16.msra.mxu2 %v1586_v62 }
  0xce   :  { %v423_v20 = vadd.f32 %v422_v17, %v145_v10  ;;  %v435_v24 = vpop.f32.mrf.mxu3 }
  0xd0   :  { %v436_v25 = vadd.f32 %v435_v24, %v423_v20 }
  0xd1   :  { %587 = vmatpush.bf16.msrb.mxu0 %v1381_v46  ;;  %613 = vmatpush.bf16.msra.mxu2 %v1614_v11 }
  0xd2   :  { %1167 = vtanh.f32 %v436_v25 }
  0xd3   :  { %v1816_v56 = vpop.f32.mrf.mxu1 }
  0xd5   :  { %v424_v35 = vpop.f32.mrf.mxu2  ;;  %588 = vmatpush.bf16.msrb.mxu0 %v1414_v57  ;;  %614 = vmatpush.bf16.msra.mxu2 %v1636_v32 }
  0xd6   :  { %v437_v36 = vpop.f32.mrf.mxu3  ;;  %v148_v35 = vadd.f32 %v147_v27, %v1760_v6 }
  0xd8   :  { %v1168_v38 = vpop.eup %1167 }
  0xd9   :  { %v1780_v28 = vsel %vm989_vm1, %v1168_v38, %v1468_v16  ;;  %589 = vmatpush.bf16.msrb.mxu0 %v1456_v9  ;;  %615 = vmatpush.bf16.msra.mxu2 %v1660_v42  ;;  %v106_v16 = vpop.f32.mrf.mxu0 }
  0xda   :  { %v451_v40 = vpack.c.bf16 %v1780_v28, %v1780_v28  ;;  %v107_v17 = vadd.f32 %v106_v16, %v1742_v50 }
  0xdb   :  { %v1820_v59 = vpop.f32.mrf.mxu1 }
  0xdc   :  { %473 = vmatmul.bf16.vlgmr.msrb.gmra.mxu1 %v451_v40  ;;  %499 = vmatmul.bf16.vlgmr.msra.gmra.mxu3 %v451_v40 }
  0xdd   :  { %595 = vmatpush.bf16.msrb.mxu1 %v1267_v8  ;;  %621 = vmatpush.bf16.msra.mxu3 %v1473_v18 }
  0xe1   :  { %596 = vmatpush.bf16.msrb.mxu1 %v1288_v15  ;;  %622 = vmatpush.bf16.msra.mxu3 %v1512_v33  ;;  %v1802_v45 = vpop.f32.mrf.mxu0 }
  0xe3   :  { %v1822_v5 = vpop.f32.mrf.mxu1 }
  0xe4   :  { %2108 = vst [vmem:[#allocation7_spill] sm:$0xff] %v1822_v5 }
  0xe5   :  { %597 = vmatpush.bf16.msrb.mxu1 %v1312_v23  ;;  %623 = vmatpush.bf16.msra.mxu3 %v1540_v43 }
  0xe9   :  { %598 = vmatpush.bf16.msrb.mxu1 %v1336_v31  ;;  %624 = vmatpush.bf16.msra.mxu3 %v1568_v54  ;;  %v1804_v22 = vpop.f32.mrf.mxu0 }
  0xeb   :  { %v1824_v10 = vpop.f32.mrf.mxu1 }
  0xed   :  { %599 = vmatpush.bf16.msrb.mxu1 %v1360_v39  ;;  %625 = vmatpush.bf16.msra.mxu3 %v1593_v0 }
  0xf1   :  { %600 = vmatpush.bf16.msrb.mxu1 %v1390_v49  ;;  %626 = vmatpush.bf16.msra.mxu3 %v1621_v19  ;;  %v1806_v47 = vpop.f32.mrf.mxu0 }
  0xf5   :  { %601 = vmatpush.bf16.msrb.mxu1 %v1426_v61  ;;  %627 = vmatpush.bf16.msra.mxu3 %v1640_v34 }
  0xf9   :  { %602 = vmatpush.bf16.msrb.mxu1 %v1464_v13  ;;  %628 = vmatpush.bf16.msra.mxu3 %v1663_v44  ;;  %v1810_v51 = vpop.f32.mrf.mxu0 }
 0x101   :  { %v1814_v55 = vpop.f32.mrf.mxu0 }
 0x109   :  { %v1818_v58 = vpop.f32.mrf.mxu0 }
 0x10a   :  { %2107 = vst [vmem:[#allocation6_spill] sm:$0xff] %v1818_v58 }
 0x139   :  { %v461_v63 = vpop.f32.mrf.mxu0 }
 0x13a   :  { %v462_v20 = vadd.f32 %v461_v63, %v107_v17 }
 0x13f   :  { %v487_v1 = vpop.f32.mrf.mxu2 }
 0x140   :  { %v488_v36 = vadd.f32 %v487_v1, %v148_v35 }
 0x141   :  { %v463_v2 = vpop.f32.mrf.mxu0 }
 0x147   :  { %v489_v7 = vpop.f32.mrf.mxu2 }
 0x159   :  { %v474_v24 = vpop.f32.mrf.mxu1 }
 0x15a   :  { %v475_v25 = vadd.f32 %v474_v24, %v462_v20 }
 0x15c   :  { %1169 = vtanh.f32 %v475_v25  ;;  %v151_v25 = vadd.f32 %v1808_v48, %v1760_v6 }
 0x15f   :  { %v500_v38 = vpop.f32.mrf.mxu3 }
 0x160   :  { %v501_v40 = vadd.f32 %v500_v38, %v488_v36 }
 0x161   :  { %v476_v58 = vpop.f32.mrf.mxu1 }
 0x162   :  { %v1170_v2 = vpop.eup %1169  ;;  %1171 = vtanh.f32 %v501_v40 }
 0x163   :  { %v506_v7 = vsel %vm1118_vm2, %v1170_v2, %v1752_v3 }
 0x164   :  { %v515_v5 = vpack.c.bf16 %v506_v7, %v506_v7 }
 0x166   :  { %525 = vmatmul.bf16.vlgmr.msra.gmra.mxu0 %v515_v5  ;;  %551 = vmatmul.bf16.vlgmr.msrb.gmra.mxu2 %v515_v5 }
 0x167   :  { %v502_v16 = vpop.f32.mrf.mxu3  ;;  %647 = vmatpush.bf16.msra.mxu0 %v1256_v4  ;;  %673 = vmatpush.bf16.msrb.mxu2 %v1466_v14 }
 0x168   :  { %v1172_v27 = vpop.eup %1171 }
 0x169   :  { %v507_v63 = vsel %vm1119_vm3, %v1172_v27, %v1780_v28  ;;  %v110_v28 = vadd.f32 %v1802_v45, %v1742_v50 }
 0x16a   :  { %v516_v1 = vpack.c.bf16 %v507_v63, %v507_v63 }
 0x16b   :  { %648 = vmatpush.bf16.msra.mxu0 %v1279_v12  ;;  %674 = vmatpush.bf16.msrb.mxu2 %v1506_v30 }
 0x16c   :  { %538 = vmatmul.bf16.vlgmr.msra.gmra.mxu1 %v516_v1  ;;  %564 = vmatmul.bf16.vlgmr.msrb.gmra.mxu3 %v516_v1 }
 0x16d   :  { %660 = vmatpush.bf16.msra.mxu1 %v1267_v8  ;;  %686 = vmatpush.bf16.msrb.mxu3 %v1473_v18 }
 0x16f   :  { %649 = vmatpush.bf16.msra.mxu0 %v1306_v21  ;;  %675 = vmatpush.bf16.msrb.mxu2 %v1533_v41 }
 0x171   :  { %661 = vmatpush.bf16.msra.mxu1 %v1288_v15  ;;  %687 = vmatpush.bf16.msrb.mxu3 %v1512_v33 }
 0x173   :  { %650 = vmatpush.bf16.msra.mxu0 %v1330_v29  ;;  %676 = vmatpush.bf16.msrb.mxu2 %v1561_v52 }
 0x175   :  { %662 = vmatpush.bf16.msra.mxu1 %v1312_v23  ;;  %688 = vmatpush.bf16.msrb.mxu3 %v1540_v43 }
 0x177   :  { %651 = vmatpush.bf16.msra.mxu0 %v1354_v37  ;;  %677 = vmatpush.bf16.msrb.mxu2 %v1586_v62 }
 0x179   :  { %663 = vmatpush.bf16.msra.mxu1 %v1336_v31  ;;  %689 = vmatpush.bf16.msrb.mxu3 %v1568_v54 }
 0x17b   :  { %652 = vmatpush.bf16.msra.mxu0 %v1381_v46  ;;  %678 = vmatpush.bf16.msrb.mxu2 %v1614_v11 }
 0x17d   :  { %664 = vmatpush.bf16.msra.mxu1 %v1360_v39  ;;  %690 = vmatpush.bf16.msrb.mxu3 %v1593_v0 }
 0x17f   :  { %653 = vmatpush.bf16.msra.mxu0 %v1414_v57  ;;  %679 = vmatpush.bf16.msrb.mxu2 %v1636_v32 }
 0x181   :  { %665 = vmatpush.bf16.msra.mxu1 %v1390_v49  ;;  %691 = vmatpush.bf16.msrb.mxu3 %v1621_v19 }
 0x183   :  { %654 = vmatpush.bf16.msra.mxu0 %v1456_v9  ;;  %680 = vmatpush.bf16.msrb.mxu2 %v1660_v42 }
 0x185   :  { %666 = vmatpush.bf16.msra.mxu1 %v1426_v61  ;;  %692 = vmatpush.bf16.msrb.mxu3 %v1640_v34 }
 0x189   :  { %667 = vmatpush.bf16.msra.mxu1 %v1464_v13  ;;  %693 = vmatpush.bf16.msrb.mxu3 %v1663_v44 }
 0x1e3   :  { %v526_v3 = vpop.f32.mrf.mxu0 }
 0x1e4   :  { %v527_v58 = vadd.f32 %v526_v3, %v110_v28 }
 0x1e9   :  { %v539_v5 = vpop.f32.mrf.mxu1  ;;  %v552_v17 = vpop.f32.mrf.mxu2 }
 0x1ea   :  { %v540_v20 = vadd.f32 %v539_v5, %v527_v58  ;;  %v553_v35 = vadd.f32 %v552_v17, %v151_v25  ;;  %v154_v25 = vadd.f32 %v1812_v53, %v1760_v6 }
 0x1eb   :  { %v528_v24 = vpop.f32.mrf.mxu0 }
 0x1ec   :  { %1173 = vtanh.f32 %v540_v20 }
 0x1ef   :  { %v565_v36 = vpop.f32.mrf.mxu3 }
 0x1f0   :  { %v566_v38 = vadd.f32 %v565_v36, %v553_v35 }
 0x1f1   :  { %v541_v40 = vpop.f32.mrf.mxu1  ;;  %v554_v2 = vpop.f32.mrf.mxu2 }
 0x1f2   :  { %v1174_v16 = vpop.eup %1173  ;;  %1175 = vtanh.f32 %v566_v38 }
 0x1f3   :  { %v571_v27 = vsel %vm1120_vm4, %v1174_v16, %v506_v7 }
 0x1f4   :  { %v580_v45 = vpack.c.bf16 %v571_v27, %v571_v27 }
 0x1f6   :  { %590 = vmatmul.bf16.vlgmr.msrb.gmra.mxu0 %v580_v45  ;;  %616 = vmatmul.bf16.vlgmr.msra.gmra.mxu2 %v580_v45 }
 0x1f7   :  { %v567_v1 = vpop.f32.mrf.mxu3  ;;  %712 = vmatpush.bf16.msrb.mxu0 %v1256_v4  ;;  %738 = vmatpush.bf16.msra.mxu2 %v1466_v14 }
 0x1f8   :  { %v1176_v48 = vpop.eup %1175 }
 0x1f9   :  { %v572_v3 = vsel %vm1121_vm5, %v1176_v48, %v507_v63  ;;  %v113_v63 = vadd.f32 %v1804_v22, %v1742_v50 }
 0x1fa   :  { %v581_v28 = vpack.c.bf16 %v572_v3, %v572_v3 }
 0x1fb   :  { %713 = vmatpush.bf16.msrb.mxu0 %v1279_v12  ;;  %739 = vmatpush.bf16.msra.mxu2 %v1506_v30 }
 0x1fc   :  { %603 = vmatmul.bf16.vlgmr.msrb.gmra.mxu1 %v581_v28  ;;  %629 = vmatmul.bf16.vlgmr.msra.gmra.mxu3 %v581_v28 }
 0x1fd   :  { %725 = vmatpush.bf16.msrb.mxu1 %v1267_v8  ;;  %751 = vmatpush.bf16.msra.mxu3 %v1473_v18 }
 0x1ff   :  { %714 = vmatpush.bf16.msrb.mxu0 %v1306_v21  ;;  %740 = vmatpush.bf16.msra.mxu2 %v1533_v41 }
 0x201   :  { %726 = vmatpush.bf16.msrb.mxu1 %v1288_v15  ;;  %752 = vmatpush.bf16.msra.mxu3 %v1512_v33 }
 0x203   :  { %715 = vmatpush.bf16.msrb.mxu0 %v1330_v29  ;;  %741 = vmatpush.bf16.msra.mxu2 %v1561_v52 }
 0x205   :  { %727 = vmatpush.bf16.msrb.mxu1 %v1312_v23  ;;  %753 = vmatpush.bf16.msra.mxu3 %v1540_v43 }
 0x207   :  { %716 = vmatpush.bf16.msrb.mxu0 %v1354_v37  ;;  %742 = vmatpush.bf16.msra.mxu2 %v1586_v62 }
 0x209   :  { %728 = vmatpush.bf16.msrb.mxu1 %v1336_v31  ;;  %754 = vmatpush.bf16.msra.mxu3 %v1568_v54 }
 0x20b   :  { %717 = vmatpush.bf16.msrb.mxu0 %v1381_v46  ;;  %743 = vmatpush.bf16.msra.mxu2 %v1614_v11 }
 0x20d   :  { %729 = vmatpush.bf16.msrb.mxu1 %v1360_v39  ;;  %755 = vmatpush.bf16.msra.mxu3 %v1593_v0 }
 0x20f   :  { %718 = vmatpush.bf16.msrb.mxu0 %v1414_v57  ;;  %744 = vmatpush.bf16.msra.mxu2 %v1636_v32 }
 0x211   :  { %730 = vmatpush.bf16.msrb.mxu1 %v1390_v49  ;;  %756 = vmatpush.bf16.msra.mxu3 %v1621_v19 }
 0x213   :  { %719 = vmatpush.bf16.msrb.mxu0 %v1456_v9  ;;  %745 = vmatpush.bf16.msra.mxu2 %v1660_v42 }
 0x215   :  { %731 = vmatpush.bf16.msrb.mxu1 %v1426_v61  ;;  %757 = vmatpush.bf16.msra.mxu3 %v1640_v34 }
 0x219   :  { %732 = vmatpush.bf16.msrb.mxu1 %v1464_v13  ;;  %758 = vmatpush.bf16.msra.mxu3 %v1663_v44 }
 0x273   :  { %v591_v7 = vpop.f32.mrf.mxu0 }
 0x274   :  { %v592_v58 = vadd.f32 %v591_v7, %v113_v63 }
 0x279   :  { %v604_v5 = vpop.f32.mrf.mxu1  ;;  %v617_v17 = vpop.f32.mrf.mxu2 }
 0x27a   :  { %v605_v20 = vadd.f32 %v604_v5, %v592_v58  ;;  %v618_v35 = vadd.f32 %v617_v17, %v154_v25 }
 0x27b   :  { %v593_v24 = vpop.f32.mrf.mxu0 }
 0x27c   :  { %1177 = vtanh.f32 %v605_v20  ;;  %v157_v20 = vadd.f32 %v1816_v56, %v1760_v6 }
 0x27f   :  { %v630_v36 = vpop.f32.mrf.mxu3 }
 0x280   :  { %v631_v38 = vadd.f32 %v630_v36, %v618_v35 }
 0x281   :  { %v606_v40 = vpop.f32.mrf.mxu1  ;;  %v619_v2 = vpop.f32.mrf.mxu2 }
 0x282   :  { %v1178_v16 = vpop.eup %1177  ;;  %1179 = vtanh.f32 %v631_v38 }
 0x283   :  { %v636_v45 = vsel %vm1122_vm6, %v1178_v16, %v571_v27 }
 0x284   :  { %v645_v22 = vpack.c.bf16 %v636_v45, %v636_v45 }
 0x286   :  { %655 = vmatmul.bf16.vlgmr.msra.gmra.mxu0 %v645_v22  ;;  %681 = vmatmul.bf16.vlgmr.msrb.gmra.mxu2 %v645_v22 }
 0x287   :  { %v632_v1 = vpop.f32.mrf.mxu3  ;;  %777 = vmatpush.bf16.msra.mxu0 %v1256_v4  ;;  %803 = vmatpush.bf16.msrb.mxu2 %v1466_v14 }
 0x288   :  { %v1180_v53 = vpop.eup %1179 }
 0x289   :  { %v637_v48 = vsel %vm1123_vm7, %v1180_v53, %v572_v3  ;;  %v116_v3 = vadd.f32 %v1806_v47, %v1742_v50 }
 0x28a   :  { %v646_v28 = vpack.c.bf16 %v637_v48, %v637_v48 }
 0x28b   :  { %778 = vmatpush.bf16.msra.mxu0 %v1279_v12  ;;  %804 = vmatpush.bf16.msrb.mxu2 %v1506_v30 }
 0x28c   :  { %668 = vmatmul.bf16.vlgmr.msra.gmra.mxu1 %v646_v28  ;;  %694 = vmatmul.bf16.vlgmr.msrb.gmra.mxu3 %v646_v28 }
 0x28d   :  { %790 = vmatpush.bf16.msra.mxu1 %v1267_v8  ;;  %816 = vmatpush.bf16.msrb.mxu3 %v1473_v18 }
 0x28f   :  { %779 = vmatpush.bf16.msra.mxu0 %v1306_v21  ;;  %805 = vmatpush.bf16.msrb.mxu2 %v1533_v41 }
 0x291   :  { %791 = vmatpush.bf16.msra.mxu1 %v1288_v15  ;;  %817 = vmatpush.bf16.msrb.mxu3 %v1512_v33 }
 0x293   :  { %780 = vmatpush.bf16.msra.mxu0 %v1330_v29  ;;  %806 = vmatpush.bf16.msrb.mxu2 %v1561_v52 }
 0x295   :  { %792 = vmatpush.bf16.msra.mxu1 %v1312_v23  ;;  %818 = vmatpush.bf16.msrb.mxu3 %v1540_v43 }
 0x297   :  { %781 = vmatpush.bf16.msra.mxu0 %v1354_v37  ;;  %807 = vmatpush.bf16.msrb.mxu2 %v1586_v62 }
 0x299   :  { %793 = vmatpush.bf16.msra.mxu1 %v1336_v31  ;;  %819 = vmatpush.bf16.msrb.mxu3 %v1568_v54 }
 0x29b   :  { %782 = vmatpush.bf16.msra.mxu0 %v1381_v46  ;;  %808 = vmatpush.bf16.msrb.mxu2 %v1614_v11 }
 0x29d   :  { %794 = vmatpush.bf16.msra.mxu1 %v1360_v39  ;;  %820 = vmatpush.bf16.msrb.mxu3 %v1593_v0 }
 0x29f   :  { %783 = vmatpush.bf16.msra.mxu0 %v1414_v57  ;;  %809 = vmatpush.bf16.msrb.mxu2 %v1636_v32 }
 0x2a1   :  { %795 = vmatpush.bf16.msra.mxu1 %v1390_v49  ;;  %821 = vmatpush.bf16.msrb.mxu3 %v1621_v19 }
 0x2a3   :  { %784 = vmatpush.bf16.msra.mxu0 %v1456_v9  ;;  %810 = vmatpush.bf16.msrb.mxu2 %v1660_v42 }
 0x2a5   :  { %796 = vmatpush.bf16.msra.mxu1 %v1426_v61  ;;  %822 = vmatpush.bf16.msrb.mxu3 %v1640_v34 }
 0x2a9   :  { %797 = vmatpush.bf16.msra.mxu1 %v1464_v13  ;;  %823 = vmatpush.bf16.msrb.mxu3 %v1663_v44 }
 0x303   :  { %v656_v27 = vpop.f32.mrf.mxu0 }
 0x304   :  { %v657_v7 = vadd.f32 %v656_v27, %v116_v3 }
 0x309   :  { %v669_v63 = vpop.f32.mrf.mxu1  ;;  %v682_v58 = vpop.f32.mrf.mxu2 }
 0x30a   :  { %v670_v5 = vadd.f32 %v669_v63, %v657_v7  ;;  %v683_v24 = vadd.f32 %v682_v58, %v157_v20  ;;  %v2110_v63 = vld [vmem:[#allocation6_spill] sm:$0xff] }
 0x30b   :  { %v658_v17 = vpop.f32.mrf.mxu0  ;;  %v125_v58 = vadd.f32 %v2110_v63, %v1742_v50 }
 0x30c   :  { %1181 = vtanh.f32 %v670_v5 }
 0x30f   :  { %v695_v25 = vpop.f32.mrf.mxu3 }
 0x310   :  { %v696_v35 = vadd.f32 %v695_v25, %v683_v24 }
 0x311   :  { %v671_v36 = vpop.f32.mrf.mxu1  ;;  %v684_v38 = vpop.f32.mrf.mxu2 }
 0x312   :  { %v1182_v40 = vpop.eup %1181  ;;  %1183 = vtanh.f32 %v696_v35  ;;  %v166_v35 = vadd.f32 %v1824_v10, %v1760_v6 }
 0x313   :  { %v701_v2 = vsel %vm1124_vm8, %v1182_v40, %v636_v45 }
 0x314   :  { %v710_v47 = vpack.c.bf16 %v701_v2, %v701_v2 }
 0x316   :  { %720 = vmatmul.bf16.vlgmr.msrb.gmra.mxu0 %v710_v47  ;;  %746 = vmatmul.bf16.vlgmr.msra.gmra.mxu2 %v710_v47 }
 0x317   :  { %v697_v16 = vpop.f32.mrf.mxu3  ;;  %842 = vmatpush.bf16.msrb.mxu0 %v1256_v4  ;;  %868 = vmatpush.bf16.msra.mxu2 %v1466_v14 }
 0x318   :  { %v1184_v56 = vpop.eup %1183 }
 0x319   :  { %v702_v22 = vsel %vm1125_vm9, %v1184_v56, %v637_v48 }
 0x31a   :  { %v711_v1 = vpack.c.bf16 %v702_v22, %v702_v22 }
 0x31b   :  { %843 = vmatpush.bf16.msrb.mxu0 %v1279_v12  ;;  %869 = vmatpush.bf16.msra.mxu2 %v1506_v30 }
 0x31c   :  { %733 = vmatmul.bf16.vlgmr.msrb.gmra.mxu1 %v711_v1  ;;  %759 = vmatmul.bf16.vlgmr.msra.gmra.mxu3 %v711_v1 }
 0x31d   :  { %855 = vmatpush.bf16.msrb.mxu1 %v1267_v8  ;;  %881 = vmatpush.bf16.msra.mxu3 %v1473_v18  ;;  %v119_v8 = vadd.f32 %v1810_v51, %v1742_v50 }
 0x31f   :  { %844 = vmatpush.bf16.msrb.mxu0 %v1306_v21  ;;  %870 = vmatpush.bf16.msra.mxu2 %v1533_v41 }
 0x321   :  { %856 = vmatpush.bf16.msrb.mxu1 %v1288_v15  ;;  %882 = vmatpush.bf16.msra.mxu3 %v1512_v33 }
 0x323   :  { %845 = vmatpush.bf16.msrb.mxu0 %v1330_v29  ;;  %871 = vmatpush.bf16.msra.mxu2 %v1561_v52 }
 0x325   :  { %857 = vmatpush.bf16.msrb.mxu1 %v1312_v23  ;;  %883 = vmatpush.bf16.msra.mxu3 %v1540_v43  ;;  %v122_v43 = vadd.f32 %v1814_v55, %v1742_v50 }
 0x327   :  { %846 = vmatpush.bf16.msrb.mxu0 %v1354_v37  ;;  %872 = vmatpush.bf16.msra.mxu2 %v1586_v62 }
 0x329   :  { %858 = vmatpush.bf16.msrb.mxu1 %v1336_v31  ;;  %884 = vmatpush.bf16.msra.mxu3 %v1568_v54  ;;  %v160_v31 = vadd.f32 %v1820_v59, %v1760_v6 }
 0x32b   :  { %847 = vmatpush.bf16.msrb.mxu0 %v1381_v46  ;;  %873 = vmatpush.bf16.msra.mxu2 %v1614_v11 }
 0x32d   :  { %859 = vmatpush.bf16.msrb.mxu1 %v1360_v39  ;;  %885 = vmatpush.bf16.msra.mxu3 %v1593_v0 }
 0x32f   :  { %848 = vmatpush.bf16.msrb.mxu0 %v1414_v57  ;;  %874 = vmatpush.bf16.msra.mxu2 %v1636_v32 }
 0x331   :  { %860 = vmatpush.bf16.msrb.mxu1 %v1390_v49  ;;  %886 = vmatpush.bf16.msra.mxu3 %v1621_v19  ;;  %v2109_v19 = vld [vmem:[#allocation7_spill] sm:$0xff] }
 0x332   :  { %v163_v32 = vadd.f32 %v2109_v19, %v1760_v6 }
 0x333   :  { %849 = vmatpush.bf16.msrb.mxu0 %v1456_v9  ;;  %875 = vmatpush.bf16.msra.mxu2 %v1660_v42 }
 0x335   :  { %861 = vmatpush.bf16.msrb.mxu1 %v1426_v61  ;;  %887 = vmatpush.bf16.msra.mxu3 %v1640_v34 }
 0x339   :  { %862 = vmatpush.bf16.msrb.mxu1 %v1464_v13  ;;  %888 = vmatpush.bf16.msra.mxu3 %v1663_v44 }
 0x393   :  { %v721_v4 = vpop.f32.mrf.mxu0 }
 0x394   :  { %v722_v12 = vadd.f32 %v721_v4, %v119_v8 }
 0x399   :  { %v734_v15 = vpop.f32.mrf.mxu1  ;;  %v747_v21 = vpop.f32.mrf.mxu2 }
 0x39a   :  { %v735_v23 = vadd.f32 %v734_v15, %v722_v12  ;;  %v748_v37 = vadd.f32 %v747_v21, %v160_v31 }
 0x39b   :  { %v723_v29 = vpop.f32.mrf.mxu0 }
 0x39c   :  { %1185 = vtanh.f32 %v735_v23 }
 0x39f   :  { %v760_v39 = vpop.f32.mrf.mxu3 }
 0x3a0   :  { %v761_v46 = vadd.f32 %v760_v39, %v748_v37 }
 0x3a1   :  { %v736_v49 = vpop.f32.mrf.mxu1  ;;  %v749_v57 = vpop.f32.mrf.mxu2 }
 0x3a2   :  { %v1186_v61 = vpop.eup %1185  ;;  %1187 = vtanh.f32 %v761_v46 }
 0x3a3   :  { %v766_v9 = vsel %vm1126_vm10, %v1186_v61, %v701_v2 }
 0x3a4   :  { %v775_v13 = vpack.c.bf16 %v766_v9, %v766_v9 }
 0x3a6   :  { %785 = vmatmul.bf16.vlgmr.msra.gmra.mxu0 %v775_v13  ;;  %811 = vmatmul.bf16.vlgmr.msrb.gmra.mxu2 %v775_v13 }
 0x3a7   :  { %v762_v14 = vpop.f32.mrf.mxu3 }
 0x3a8   :  { %v1188_v18 = vpop.eup %1187 }
 0x3a9   :  { %v767_v30 = vsel %vm1127_vm11, %v1188_v18, %v702_v22 }
 0x3aa   :  { %v776_v33 = vpack.c.bf16 %v767_v30, %v767_v30 }
 0x3ac   :  { %798 = vmatmul.bf16.vlgmr.msra.gmra.mxu1 %v776_v33  ;;  %824 = vmatmul.bf16.vlgmr.msrb.gmra.mxu3 %v776_v33 }
 0x423   :  { %v786_v41 = vpop.f32.mrf.mxu0 }
 0x424   :  { %v787_v52 = vadd.f32 %v786_v41, %v122_v43 }
 0x429   :  { %v799_v54 = vpop.f32.mrf.mxu1  ;;  %v812_v62 = vpop.f32.mrf.mxu2 }
 0x42a   :  { %v800_v0 = vadd.f32 %v799_v54, %v787_v52  ;;  %v813_v34 = vadd.f32 %v812_v62, %v163_v32 }
 0x42b   :  { %v788_v11 = vpop.f32.mrf.mxu0 }
 0x42c   :  { %1189 = vtanh.f32 %v800_v0 }
 0x42f   :  { %v825_v42 = vpop.f32.mrf.mxu3 }
 0x430   :  { %v826_v44 = vadd.f32 %v825_v42, %v813_v34 }
 0x431   :  { %v801_v51 = vpop.f32.mrf.mxu1  ;;  %v814_v59 = vpop.f32.mrf.mxu2 }
 0x432   :  { %v1190_v45 = vpop.eup %1189  ;;  %1191 = vtanh.f32 %v826_v44 }
 0x433   :  { %v831_v53 = vsel %vm1128_vm12, %v1190_v45, %v766_v9 }
 0x434   :  { %v840_v55 = vpack.c.bf16 %v831_v53, %v831_v53 }
 0x436   :  { %850 = vmatmul.bf16.vlgmr.msrb.gmra.mxu0 %v840_v55  ;;  %876 = vmatmul.bf16.vlgmr.msra.gmra.mxu2 %v840_v55 }
 0x437   :  { %v827_v48 = vpop.f32.mrf.mxu3 }
 0x438   :  { %v1192_v28 = vpop.eup %1191 }
 0x439   :  { %v832_v27 = vsel %vm1129_vm13, %v1192_v28, %v767_v30 }
 0x43a   :  { %v841_v3 = vpack.c.bf16 %v832_v27, %v832_v27 }
 0x43c   :  { %863 = vmatmul.bf16.vlgmr.msrb.gmra.mxu1 %v841_v3  ;;  %889 = vmatmul.bf16.vlgmr.msra.gmra.mxu3 %v841_v3 }
 0x4b3   :  { %v851_v7 = vpop.f32.mrf.mxu0 }
 0x4b4   :  { %v852_v5 = vadd.f32 %v851_v7, %v125_v58 }
 0x4b9   :  { %v864_v17 = vpop.f32.mrf.mxu1  ;;  %v877_v20 = vpop.f32.mrf.mxu2 }
 0x4ba   :  { %v865_v24 = vadd.f32 %v864_v17, %v852_v5  ;;  %v878_v36 = vadd.f32 %v877_v20, %v166_v35 }
 0x4bb   :  { %v853_v25 = vpop.f32.mrf.mxu0 }
 0x4bc   :  { %1193 = vtanh.f32 %v865_v24 }
 0x4bf   :  { %v890_v38 = vpop.f32.mrf.mxu3 }
 0x4c0   :  { %v891_v40 = vadd.f32 %v890_v38, %v878_v36 }
 0x4c1   :  { %v866_v2 = vpop.f32.mrf.mxu1  ;;  %v879_v47 = vpop.f32.mrf.mxu2 }
 0x4c2   :  { %v1194_v16 = vpop.eup %1193  ;;  %1195 = vtanh.f32 %v891_v40 }
 0x4c3   :  { %v896_v56 = vsel %vm1130_vm14, %v1194_v16, %v831_v53 }
 0x4c4   :  { %898 = vst [vmem:[#allocation2] sm:$0xff] %v896_v56 }
 0x4c7   :  { %v892_v50 = vpop.f32.mrf.mxu3 }
 0x4c8   :  { %v1196_v22 = vpop.eup %1195 }
 0x4c9   :  { %v897_v1 = vsel %vm1131_vm15, %v1196_v22, %v832_v27 }
 0x4ca   :  { %899 = vst [vmem:[#allocation2 + $0x8] sm:$0xff] %v897_v1 }
 0x4cb PF:  { %v920_v6 = vld [vmem:[%s2104_s6 + $0x78] sm:$0xff]  ;;  %v919_v60 = vld [vmem:[%s2104_s6 + $0x70] sm:$0xff]  ;;  %v918_v4 = vld [vmem:[%s2104_s6 + $0x68] sm:$0xff] }
 0x4cc   :  { %v936_v10 = vld [vmem:[%s2104_s6 + $0xf8] sm:$0xff]  ;;  %941 = vmatpush.msra.mxu0 %v920_v6  ;;  %v935_v26 = vld [vmem:[%s2104_s6 + $0xf0] sm:$0xff]  ;;  %v934_v8 = vld [vmem:[%s2104_s6 + $0xe8] sm:$0xff] }
 0x4cd   :  { %961 = vmatpush.msra.mxu1 %v936_v10  ;;  %v917_v12 = vld [vmem:[%s2104_s6 + $0x60] sm:$0xff]  ;;  %v916_v21 = vld [vmem:[%s2104_s6 + $0x58] sm:$0xff]  ;;  %v915_v29 = vld [vmem:[%s2104_s6 + $0x50] sm:$0xff] }
 0x4ce   :  { %942 = vmatpush.msra.mxu0 %v919_v60  ;;  %v933_v15 = vld [vmem:[%s2104_s6 + $0xe0] sm:$0xff]  ;;  %v932_v23 = vld [vmem:[%s2104_s6 + $0xd8] sm:$0xff]  ;;  %v931_v31 = vld [vmem:[%s2104_s6 + $0xd0] sm:$0xff] }
 0x4cf   :  { %962 = vmatpush.msra.mxu1 %v935_v26  ;;  %v914_v37 = vld [vmem:[%s2104_s6 + $0x48] sm:$0xff]  ;;  %v913_v46 = vld [vmem:[%s2104_s6 + $0x40] sm:$0xff]  ;;  %v912_v57 = vld [vmem:[%s2104_s6 + $0x38] sm:$0xff] }
 0x4d0   :  { %943 = vmatpush.msra.mxu0 %v918_v4  ;;  %v930_v39 = vld [vmem:[%s2104_s6 + $0xc8] sm:$0xff]  ;;  %v929_v49 = vld [vmem:[%s2104_s6 + $0xc0] sm:$0xff]  ;;  %v928_v61 = vld [vmem:[%s2104_s6 + $0xb8] sm:$0xff] }
 0x4d1   :  { %963 = vmatpush.msra.mxu1 %v934_v8  ;;  %v911_v9 = vld [vmem:[%s2104_s6 + $0x30] sm:$0xff]  ;;  %v910_v14 = vld [vmem:[%s2104_s6 + $0x28] sm:$0xff]  ;;  %v909_v30 = vld [vmem:[%s2104_s6 + $0x20] sm:$0xff] }
 0x4d2   :  { %944 = vmatpush.msra.mxu0 %v917_v12  ;;  %v927_v13 = vld [vmem:[%s2104_s6 + $0xb0] sm:$0xff]  ;;  %v926_v18 = vld [vmem:[%s2104_s6 + $0xa8] sm:$0xff]  ;;  %v925_v33 = vld [vmem:[%s2104_s6 + $0xa0] sm:$0xff] }
 0x4d3   :  { %964 = vmatpush.msra.mxu1 %v933_v15  ;;  %v908_v41 = vld [vmem:[%s2104_s6 + $0x18] sm:$0xff]  ;;  %v907_v52 = vld [vmem:[%s2104_s6 + $0x10] sm:$0xff]  ;;  %v906_v62 = vld [vmem:[%s2104_s6 + $0x8] sm:$0xff] }
 0x4d4   :  { %945 = vmatpush.msra.mxu0 %v916_v21  ;;  %v924_v43 = vld [vmem:[%s2104_s6 + $0x98] sm:$0xff]  ;;  %v923_v54 = vld [vmem:[%s2104_s6 + $0x90] sm:$0xff]  ;;  %v922_v0 = vld [vmem:[%s2104_s6 + $0x88] sm:$0xff] }
 0x4d5   :  { %965 = vmatpush.msra.mxu1 %v932_v23  ;;  %v905_v11 = vld [vmem:[%s2104_s6] sm:$0xff]  ;;  %v904_v34 = vld [vmem:[#allocation2 + $0x8] sm:$0xff] }
 0x4d6   :  { %946 = vmatpush.msra.mxu0 %v915_v29  ;;  %v921_v19 = vld [vmem:[%s2104_s6 + $0x80] sm:$0xff] }
 0x4d7   :  { %966 = vmatpush.msra.mxu1 %v931_v31  ;;  %v903_v32 = vld [vmem:[#allocation2] sm:$0xff] }
 0x4d8   :  { %947 = vmatpush.msra.mxu0 %v914_v37  ;;  %v1197_v42 = vld [vmem:[%s2105_s7] ss:$0 sm:$0xff] }
 0x4d9   :  { %967 = vmatpush.msra.mxu1 %v930_v39 }
 0x4da   :  { %948 = vmatpush.msra.mxu0 %v913_v46 }
 0x4db   :  { %968 = vmatpush.msra.mxu1 %v929_v49 }
 0x4dc   :  { %949 = vmatpush.msra.mxu0 %v912_v57 }
 0x4dd   :  { %969 = vmatpush.msra.mxu1 %v928_v61 }
 0x4de   :  { %950 = vmatpush.msra.mxu0 %v911_v9 }
 0x4df   :  { %970 = vmatpush.msra.mxu1 %v927_v13 }
 0x4e0   :  { %951 = vmatpush.msra.mxu0 %v910_v14 }
 0x4e1   :  { %971 = vmatpush.msra.mxu1 %v926_v18 }
 0x4e2   :  { %952 = vmatpush.msra.mxu0 %v909_v30 }
 0x4e3   :  { %972 = vmatpush.msra.mxu1 %v925_v33 }
 0x4e4   :  { %953 = vmatpush.msra.mxu0 %v908_v41 }
 0x4e5   :  { %973 = vmatpush.msra.mxu1 %v924_v43 }
 0x4e6   :  { %954 = vmatpush.msra.mxu0 %v907_v52 }
 0x4e7   :  { %974 = vmatpush.msra.mxu1 %v923_v54 }
 0x4e8   :  { %955 = vmatpush.msra.mxu0 %v906_v62 }
 0x4e9   :  { %975 = vmatpush.msra.mxu1 %v922_v0 }
 0x4ea   :  { %956 = vmatpush.msra.mxu0 %v905_v11 }
 0x4eb   :  { %976 = vmatpush.msra.mxu1 %v921_v19  ;;  %957 = vmatmul.f32.vlgmr.msra.gmra.mxu0 %v903_v32 }
 0x4ec   :  { %977 = vmatmul.f32.vlgmr.msra.gmra.mxu1 %v904_v34 }
 0x568   :  { %v958_v44 = vpop.f32.mrf.mxu0 }
 0x569   :  { %v978_v51 = vpop.f32.mrf.mxu1  ;;  %v959_v59 = vadd.f32 %v1197_v42, %v958_v44 }
 0x56b   :  { %v979_v45 = vadd.f32 %v978_v51, %v959_v59 }
 0x56d   :  { %981 = vst [vmem:[%s2106_s8] sm:$0xff] %v979_v45 }

</bundles_post_ra>
